<compile_context>
chip_gen: v7x
topology: tpu7x:2x2x1
jax: 0.10.0
libtpu: 0.0.40
codegen_flags: <defaults>
</compile_context>

<pallas_src>
import functools

import numpy as np
import jax
import jax.numpy as jnp
from jax import lax
from jax.experimental import pallas as pl
from jax.experimental.pallas import tpu as pltpu

NQ = 25
Q_MIN = 0.0
Q_MAX = 1.0
EPS = 1e-8

MAX_TILE_N = 128    # sublane tile cap for N
MAX_TILE_M = 2048   # lane tile cap for M (large -> amortize per-grid-step overhead)


def _quantizer_constants(nq=NQ, qmin=Q_MIN, qmax=Q_MAX):
    """Trace-time numpy re-creation of APLoss.__init__ quantizer weights."""
    gap = qmax - qmin
    a = (nq - 1) / gap
    w1 = np.full((nq,), -a, dtype=np.float64)
    b1 = (a * qmin + np.arange(nq, 0, -1)).astype(np.float64)
    w2 = np.full((nq,), a, dtype=np.float64)
    b2 = (np.arange(2 - nq, 2, 1) - a * qmin).astype(np.float64)
    # q.weight[0] = q.weight[-1] = 0 ; q.bias[0] = q.bias[-1] = 1
    w1[0] = 0.0
    b1[0] = 1.0
    w2[-1] = 0.0
    b2[-1] = 1.0
    return w1, b1, w2, b2, a


_W1, _B1, _W2, _B2, _A = _quantizer_constants()
# Histogram contribution of a zero-padded column (x = 0, label = 0): derived from
# the quantizer constants, so the pad correction stays exact if they change.
_PAD_Q = np.maximum(np.minimum(_B1, _B2), 0.0)


def _tap_kernel(x_ref, lbl_ref, aps_ref, c_acc, cp_acc, np_acc, *, nq, pad_cols):
    m = pl.program_id(1)

    # ---- init accumulators at the start of each M reduction ----------------
    @pl.when(m == 0)
    def _init():
        c_acc[...] = jnp.zeros_like(c_acc)
        cp_acc[...] = jnp.zeros_like(cp_acc)
        np_acc[...] = jnp.zeros_like(np_acc)

    x = x_ref[...]        # (tile_n, tile_m) compute dtype
    lbl = lbl_ref[...]    # (tile_n, tile_m) compute dtype

    # Hoisted slope product shared by all interior bins (saves 2 muls/elem/bin).
    t = x * _A

    np_acc[...] += jnp.sum(lbl, axis=-1, keepdims=True, dtype=jnp.float32)

    # One-hot placement row built from iota (staged op -> no captured constant).
    col = lax.broadcasted_iota(jnp.int32, (1, nq), 1)

    # ---- unrolled per-bin quantizer + histogram accumulation ---------------
    c_upd = c_acc[...]     # (tile_n, nq) f32
    cp_upd = cp_acc[...]   # (tile_n, nq) f32
    for j in range(nq):
        w1j, b1j = float(_W1[j]), float(_B1[j])
        w2j, b2j = float(_W2[j]), float(_B2[j])
        # q1 = w1j*x + b1j, q2 = w2j*x + b2j, reusing t = a*x where possible.
        if w1j == 0.0:
            q1 = None                      # constant b1j
        elif w1j == -_A:
            q1 = b1j - t
        else:
            q1 = x * w1j + b1j
        if w2j == 0.0:
            q2 = None                      # constant b2j
        elif w2j == _A:
            q2 = t + b2j
        else:
            q2 = x * w2j + b2j

        if q1 is None and q2 is None:
            qmin = jnp.full_like(x, min(b1j, b2j))
        elif q1 is None:
            qmin = jnp.minimum(q2, b1j)
        elif q2 is None:
            qmin = jnp.minimum(q1, b2j)
        else:
            qmin = jnp.minimum(q1, q2)
        qj = jnp.maximum(qmin, 0.0)                       # (tile_n, tile_m)

        ej = (col == j).astype(jnp.float32)               # (1, nq) one-hot
        c_upd = c_upd + jnp.sum(qj, axis=-1, keepdims=True,
                                dtype=jnp.float32) * ej
        cp_upd = cp_upd + jnp.sum(qj * lbl, axis=-1, keepdims=True,
                                  dtype=jnp.float32) * ej
    c_acc[...] = c_upd
    cp_acc[...] = cp_upd

    # ---- finalize: tie-aware AP on the accumulated histograms --------------
    @pl.when(m == pl.num_programs(1) - 1)
    def _finalize():
        c = c_acc[...]      # (tile_n, nq)
        cp = cp_acc[...]    # (tile_n, nq)
        Np = np_acc[...]    # (tile_n, 1)

        # Remove the contribution of zero-padded M columns (labels were zero,
        # so cp / Np need no correction).
        if pad_cols:
            corr = None
            for j in range(nq):
                v = float(_PAD_Q[j])
                if v != 0.0:
                    term = (col == j).astype(jnp.float32) * (v * pad_cols)
                    corr = term if corr is None else corr + term
            if corr is not None:
                c = c - corr

        # Inclusive cumsum via an iota-built upper-triangular matmul (MXU).
        ri = lax.broadcasted_iota(jnp.int32, (nq, nq), 0)
        ci = lax.broadcasted_iota(jnp.int32, (nq, nq), 1)
        tri = (ri <= ci).astype(jnp.float32)
        C = jnp.dot(c, tri, preferred_element_type=jnp.float32)
        Cp = jnp.dot(cp, tri, preferred_element_type=jnp.float32)
        C_1d = C - c          # exclusive cumsums
        Cp_1d = Cp - cp

        ratio = jnp.maximum(cp - 1.0, 0.0) * pl.reciprocal(
            jnp.maximum(c - 1.0, 0.0) + EPS)
        aps_bins = (cp
                    * (c * ratio
                       + (Cp_1d + 1.0 - ratio * (C_1d + 1.0))
                       * jnp.log((C + 1.0) / (C_1d + 1.0)))
                    * pl.reciprocal(c + EPS)
                    * pl.reciprocal(Np))                          # (tile_n, nq)
        aps_ref[...] = jnp.sum(aps_bins, axis=-1, keepdims=True)  # (tile_n, 1)


def _round_up(v, m):
    return (v + m - 1) // m * m


def _cdiv(a, b):
    return (a + b - 1) // b


def tap_loss(x, label, *, compute_dtype=jnp.float32):
    """TAPLoss.forward (simplified=False, qw=None, ret='1-mAP').

    Returns (loss, aps): loss = 1 - mean(aps), aps shape (N,).
    compute_dtype=jnp.bfloat16 is selectable for v6e/v7x, but the slope-24
    quantizer amplifies bf16 rounding of x (~1e-2 bin error); keep float32
    unless the accuracy loss is acceptable.
    """
    N, M = x.shape

    # ---- tiling -------------------------------------------------------------
    # Force >= 2 N tiles when N > 16 so the "parallel" axis can span both
    # TensorCores on v7x (harmless single-core overhead elsewhere).
    n_tiles = max(_cdiv(N, MAX_TILE_N), 2 if N > 16 else 1)
    tile_n = _round_up(_cdiv(N, n_tiles), 8)
    n_pad = tile_n * n_tiles

    num_m = _cdiv(M, MAX_TILE_M)
    tile_m = _round_up(_cdiv(M, num_m), 128)
    m_pad = tile_m * num_m
    pad_cols = m_pad - M

    xp = x.astype(compute_dtype)
    lp = label.astype(compute_dtype)
    if (n_pad, m_pad) != (N, M):
        # Padded N rows have Np = 0 -> NaN/Inf APs in-kernel; sliced off below.
        xp = jnp.pad(xp, ((0, n_pad - N), (0, m_pad - M)))
        lp = jnp.pad(lp, ((0, n_pad - N), (0, m_pad - M)))

    kernel = functools.partial(_tap_kernel, nq=NQ, pad_cols=pad_cols)

    aps_col = pl.pallas_call(
        kernel,
        grid=(n_tiles, num_m),                       # N parallel, M reduction (last)
        out_shape=jax.ShapeDtypeStruct((n_pad, 1), jnp.float32),
        in_specs=[
            pl.BlockSpec((tile_n, tile_m), lambda n, m: (n, m)),
            pl.BlockSpec((tile_n, tile_m), lambda n, m: (n, m)),
        ],
        out_specs=pl.BlockSpec((tile_n, 1), lambda n, m: (n, 0)),
        scratch_shapes=[
            pltpu.VMEM((tile_n, NQ), jnp.float32),   # c  histogram accumulator
            pltpu.VMEM((tile_n, NQ), jnp.float32),   # cp histogram accumulator
            pltpu.VMEM((tile_n, 1), jnp.float32),    # Np accumulator
        ],
        compiler_params=pltpu.CompilerParams(
            dimension_semantics=("parallel", "arbitrary"),
            vmem_limit_bytes=48 * 1024 * 1024,
        ),
    )(xp, lp)

    aps = aps_col[:N, 0]
    loss = 1.0 - jnp.mean(aps)                       # global mean in the wrapper
    return loss, aps


def _tap_loss_reference(x, label):
    """Pure-JAX reference mirroring the PyTorch forward (simplified=False)."""
    x = x.astype(jnp.float32)
    label = label.astype(jnp.float32)
    N, M = x.shape
    w1 = jnp.asarray(_W1, jnp.float32)[:, None]
    b1 = jnp.asarray(_B1, jnp.float32)[:, None]
    w2 = jnp.asarray(_W2, jnp.float32)[:, None]
    b2 = jnp.asarray(_B2, jnp.float32)[:, None]
    q1 = x[:, None, :] * w1[None, :, :] + b1[None, :, :]
    q2 = x[:, None, :] * w2[None, :, :] + b2[None, :, :]
    q = jnp.maximum(jnp.minimum(q1, q2), 0.0)
    c = q.sum(-1)
    cp = (q * label[:, None, :]).sum(-1)
    C = jnp.cumsum(c, axis=-1)
    Cp = jnp.cumsum(cp, axis=-1)
    zeros = jnp.zeros((N, 1), jnp.float32)
    C_1d = jnp.concatenate([zeros, C[:, :-1]], axis=-1)
    Cp_1d = jnp.concatenate([zeros, Cp[:, :-1]], axis=-1)
    Np = label.sum(-1, keepdims=True)
    ratio = jnp.maximum(cp - 1.0, 0.0) / (jnp.maximum(c - 1.0, 0.0) + EPS)
    aps = cp * (c * ratio + (Cp_1d + 1.0 - ratio * (C_1d + 1.0))
                * jnp.log((C + 1.0) / (C_1d + 1.0))) / (c + EPS) / Np
    aps = aps.sum(-1)
    return 1.0 - aps.mean(), aps


if __name__ == "__main__":
    key = jax.random.PRNGKey(0)

    # (exact fit), (padded M, single tiles), (multi N tile), (multi M tile)
    test_shapes = [(4, 128), (6, 200), (136, 1300), (40, 3000)]
    for (N, M) in test_shapes:
        kx, kl, key = jax.random.split(key, 3)
        x = jax.random.uniform(kx, (N, M), dtype=jnp.float32, minval=0.0, maxval=1.0)
        label = (jax.random.uniform(kl, (N, M)) < 0.3).astype(jnp.float32)

        loss, aps = tap_loss(x, label)
        loss = jax.block_until_ready(loss)
        aps = jax.block_until_ready(aps)

        ref_loss, ref_aps = _tap_loss_reference(x, label)
        np.testing.assert_allclose(np.asarray(loss), np.asarray(ref_loss),
                                   rtol=3e-4, atol=1e-5)
        np.testing.assert_allclose(np.asarray(aps), np.asarray(ref_aps),
                                   rtol=3e-4, atol=1e-5)

    print("KERNEL_OK")
</pallas_src>

<mosaic_0001>
module attributes {stable_mosaic.version = 11 : i64} {
  func.func @_tap_kernel(%arg0: i32, %arg1: i32, %arg2: memref<8x128xf32, #tpu.memory_space<vmem>>, %arg3: memref<8x128xf32, #tpu.memory_space<vmem>>, %arg4: memref<8x1xf32, #tpu.memory_space<vmem>>, %arg5: memref<8x25xf32, #tpu.memory_space<vmem>>, %arg6: memref<8x25xf32, #tpu.memory_space<vmem>>, %arg7: memref<8x1xf32, #tpu.memory_space<vmem>>) attributes {dimension_semantics = [#tpu.dimension_semantics<parallel>, #tpu.dimension_semantics<arbitrary>], iteration_bounds = array<i64: 1, 1>, scalar_prefetch = 0 : i64, scratch_operands = 3 : i64, tpu.core_type = #tpu.core_type<tc>, window_params = [{transform_indices = @transform_0, window_bounds = array<i64: 8, 128>}, {transform_indices = @transform_1, window_bounds = array<i64: 8, 128>}, {transform_indices = @transform_2, window_bounds = array<i64: 8, 1>}]} {
    %c0_i32 = arith.constant 0 : i32
    %0 = arith.cmpi eq, %arg1, %c0_i32 : i32
    %1 = arith.extui %0 : i1 to i32
    %c0_i32_0 = arith.constant 0 : i32
    %2 = arith.cmpi ne, %1, %c0_i32_0 : i32
    scf.if %2 {
      %cst_145 = arith.constant 0.000000e+00 : f32
      %618 = vector.broadcast %cst_145 : f32 to vector<8x25xf32>
      %c0_146 = arith.constant 0 : index
      %c0_147 = arith.constant 0 : index
      %619 = vector.load %arg5[%c0_146, %c0_147] : memref<8x25xf32, #tpu.memory_space<vmem>>, vector<8x25xf32>
      tpu.vector_store %arg5[%c0_146, %c0_147], %618 {strides = array<i32>} : memref<8x25xf32, #tpu.memory_space<vmem>>, vector<8x25xf32>,
      %cst_148 = arith.constant 0.000000e+00 : f32
      %620 = vector.broadcast %cst_148 : f32 to vector<8x25xf32>
      %c0_149 = arith.constant 0 : index
      %c0_150 = arith.constant 0 : index
      %621 = vector.load %arg6[%c0_149, %c0_150] : memref<8x25xf32, #tpu.memory_space<vmem>>, vector<8x25xf32>
      tpu.vector_store %arg6[%c0_149, %c0_150], %620 {strides = array<i32>} : memref<8x25xf32, #tpu.memory_space<vmem>>, vector<8x25xf32>,
      %cst_151 = arith.constant 0.000000e+00 : f32
      %622 = vector.broadcast %cst_151 : f32 to vector<8x1xf32>
      %c0_152 = arith.constant 0 : index
      %c0_153 = arith.constant 0 : index
      %623 = vector.load %arg7[%c0_152, %c0_153] : memref<8x1xf32, #tpu.memory_space<vmem>>, vector<8x1xf32>
      tpu.vector_store %arg7[%c0_152, %c0_153], %622 {strides = array<i32>} : memref<8x1xf32, #tpu.memory_space<vmem>>, vector<8x1xf32>,
    } else {
    }
    %c0 = arith.constant 0 : index
    %c0_1 = arith.constant 0 : index
    %3 = vector.load %arg2[%c0, %c0_1] : memref<8x128xf32, #tpu.memory_space<vmem>>, vector<8x128xf32>
    %c0_2 = arith.constant 0 : index
    %c0_3 = arith.constant 0 : index
    %4 = vector.load %arg3[%c0_2, %c0_3] : memref<8x128xf32, #tpu.memory_space<vmem>>, vector<8x128xf32>
    %cst = arith.constant 2.400000e+01 : f32
    %5 = vector.broadcast %cst : f32 to vector<8x128xf32>
    %6 = arith.mulf %3, %5 : vector<8x128xf32>
    %c0_4 = arith.constant 0 : index
    %c0_5 = arith.constant 0 : index
    %7 = vector.load %arg7[%c0_4, %c0_5] : memref<8x1xf32, #tpu.memory_space<vmem>>, vector<8x1xf32>
    %cst_6 = arith.constant dense<0.000000e+00> : vector<8xf32>
    %8 = vector.multi_reduction <add>, %4, %cst_6 [1] : vector<8x128xf32> to vector<8xf32>
    %9 = vector.shape_cast %8 : vector<8xf32> to vector<8x1xf32>
    %10 = arith.addf %7, %9 : vector<8x1xf32>
    %c0_7 = arith.constant 0 : index
    %c0_8 = arith.constant 0 : index
    %11 = vector.load %arg7[%c0_7, %c0_8] : memref<8x1xf32, #tpu.memory_space<vmem>>, vector<8x1xf32>
    tpu.vector_store %arg7[%c0_7, %c0_8], %10 {strides = array<i32>} : memref<8x1xf32, #tpu.memory_space<vmem>>, vector<8x1xf32>,
    %12 = tpu.iota {dimensions = array<i32: 1>} : vector<1x25xi32>
    %c0_9 = arith.constant 0 : index
    %c0_10 = arith.constant 0 : index
    %13 = vector.load %arg5[%c0_9, %c0_10] : memref<8x25xf32, #tpu.memory_space<vmem>>, vector<8x25xf32>
    %c0_11 = arith.constant 0 : index
    %c0_12 = arith.constant 0 : index
    %14 = vector.load %arg6[%c0_11, %c0_12] : memref<8x25xf32, #tpu.memory_space<vmem>>, vector<8x25xf32>
    %cst_13 = arith.constant -2.300000e+01 : f32
    %15 = vector.broadcast %cst_13 : f32 to vector<8x128xf32>
    %16 = arith.addf %6, %15 : vector<8x128xf32>
    %cst_14 = arith.constant 1.000000e+00 : f32
    %17 = vector.broadcast %cst_14 : f32 to vector<8x128xf32>
    %18 = arith.minimumf %16, %17 : vector<8x128xf32>
    %cst_15 = arith.constant 0.000000e+00 : f32
    %19 = vector.broadcast %cst_15 : f32 to vector<8x128xf32>
    %20 = arith.maximumf %18, %19 : vector<8x128xf32>
    %c0_i32_16 = arith.constant 0 : i32
    %21 = vector.broadcast %c0_i32_16 : i32 to vector<1x25xi32>
    %22 = arith.cmpi eq, %12, %21 : vector<1x25xi32>
    %23 = arith.extui %22 : vector<1x25xi1> to vector<1x25xi32>
    %24 = arith.sitofp %23 : vector<1x25xi32> to vector<1x25xf32>
    %cst_17 = arith.constant dense<0.000000e+00> : vector<8xf32>
    %25 = vector.multi_reduction <add>, %20, %cst_17 [1] : vector<8x128xf32> to vector<8xf32>
    %26 = vector.shape_cast %25 : vector<8xf32> to vector<8x1xf32>
    %27 = vector.broadcast %26 : vector<8x1xf32> to vector<8x25xf32>
    %28 = vector.broadcast %24 : vector<1x25xf32> to vector<8x25xf32>
    %29 = arith.mulf %27, %28 : vector<8x25xf32>
    %30 = arith.addf %13, %29 : vector<8x25xf32>
    %31 = arith.mulf %20, %4 : vector<8x128xf32>
    %cst_18 = arith.constant dense<0.000000e+00> : vector<8xf32>
    %32 = vector.multi_reduction <add>, %31, %cst_18 [1] : vector<8x128xf32> to vector<8xf32>
    %33 = vector.shape_cast %32 : vector<8xf32> to vector<8x1xf32>
    %34 = vector.broadcast %33 : vector<8x1xf32> to vector<8x25xf32>
    %35 = vector.broadcast %24 : vector<1x25xf32> to vector<8x25xf32>
    %36 = arith.mulf %34, %35 : vector<8x25xf32>
    %37 = arith.addf %14, %36 : vector<8x25xf32>
    %cst_19 = arith.constant 2.400000e+01 : f32
    %38 = vector.broadcast %cst_19 : f32 to vector<8x128xf32>
    %39 = arith.subf %38, %6 : vector<8x128xf32>
    %cst_20 = arith.constant -2.200000e+01 : f32
    %40 = vector.broadcast %cst_20 : f32 to vector<8x128xf32>
    %41 = arith.addf %6, %40 : vector<8x128xf32>
    %42 = arith.minimumf %39, %41 : vector<8x128xf32>
    %cst_21 = arith.constant 0.000000e+00 : f32
    %43 = vector.broadcast %cst_21 : f32 to vector<8x128xf32>
    %44 = arith.maximumf %42, %43 : vector<8x128xf32>
    %c1_i32 = arith.constant 1 : i32
    %45 = vector.broadcast %c1_i32 : i32 to vector<1x25xi32>
    %46 = arith.cmpi eq, %12, %45 : vector<1x25xi32>
    %47 = arith.extui %46 : vector<1x25xi1> to vector<1x25xi32>
    %48 = arith.sitofp %47 : vector<1x25xi32> to vector<1x25xf32>
    %cst_22 = arith.constant dense<0.000000e+00> : vector<8xf32>
    %49 = vector.multi_reduction <add>, %44, %cst_22 [1] : vector<8x128xf32> to vector<8xf32>
    %50 = vector.shape_cast %49 : vector<8xf32> to vector<8x1xf32>
    %51 = vector.broadcast %50 : vector<8x1xf32> to vector<8x25xf32>
    %52 = vector.broadcast %48 : vector<1x25xf32> to vector<8x25xf32>
    %53 = arith.mulf %51, %52 : vector<8x25xf32>
    %54 = arith.addf %30, %53 : vector<8x25xf32>
    %55 = arith.mulf %44, %4 : vector<8x128xf32>
    %cst_23 = arith.constant dense<0.000000e+00> : vector<8xf32>
    %56 = vector.multi_reduction <add>, %55, %cst_23 [1] : vector<8x128xf32> to vector<8xf32>
    %57 = vector.shape_cast %56 : vector<8xf32> to vector<8x1xf32>
    %58 = vector.broadcast %57 : vector<8x1xf32> to vector<8x25xf32>
    %59 = vector.broadcast %48 : vector<1x25xf32> to vector<8x25xf32>
    %60 = arith.mulf %58, %59 : vector<8x25xf32>
    %61 = arith.addf %37, %60 : vector<8x25xf32>
    %cst_24 = arith.constant 2.300000e+01 : f32
    %62 = vector.broadcast %cst_24 : f32 to vector<8x128xf32>
    %63 = arith.subf %62, %6 : vector<8x128xf32>
    %cst_25 = arith.constant -2.100000e+01 : f32
    %64 = vector.broadcast %cst_25 : f32 to vector<8x128xf32>
    %65 = arith.addf %6, %64 : vector<8x128xf32>
    %66 = arith.minimumf %63, %65 : vector<8x128xf32>
    %cst_26 = arith.constant 0.000000e+00 : f32
    %67 = vector.broadcast %cst_26 : f32 to vector<8x128xf32>
    %68 = arith.maximumf %66, %67 : vector<8x128xf32>
    %c2_i32 = arith.constant 2 : i32
    %69 = vector.broadcast %c2_i32 : i32 to vector<1x25xi32>
    %70 = arith.cmpi eq, %12, %69 : vector<1x25xi32>
    %71 = arith.extui %70 : vector<1x25xi1> to vector<1x25xi32>
    %72 = arith.sitofp %71 : vector<1x25xi32> to vector<1x25xf32>
    %cst_27 = arith.constant dense<0.000000e+00> : vector<8xf32>
    %73 = vector.multi_reduction <add>, %68, %cst_27 [1] : vector<8x128xf32> to vector<8xf32>
    %74 = vector.shape_cast %73 : vector<8xf32> to vector<8x1xf32>
    %75 = vector.broadcast %74 : vector<8x1xf32> to vector<8x25xf32>
    %76 = vector.broadcast %72 : vector<1x25xf32> to vector<8x25xf32>
    %77 = arith.mulf %75, %76 : vector<8x25xf32>
    %78 = arith.addf %54, %77 : vector<8x25xf32>
    %79 = arith.mulf %68, %4 : vector<8x128xf32>
    %cst_28 = arith.constant dense<0.000000e+00> : vector<8xf32>
    %80 = vector.multi_reduction <add>, %79, %cst_28 [1] : vector<8x128xf32> to vector<8xf32>
    %81 = vector.shape_cast %80 : vector<8xf32> to vector<8x1xf32>
    %82 = vector.broadcast %81 : vector<8x1xf32> to vector<8x25xf32>
    %83 = vector.broadcast %72 : vector<1x25xf32> to vector<8x25xf32>
    %84 = arith.mulf %82, %83 : vector<8x25xf32>
    %85 = arith.addf %61, %84 : vector<8x25xf32>
    %cst_29 = arith.constant 2.200000e+01 : f32
    %86 = vector.broadcast %cst_29 : f32 to vector<8x128xf32>
    %87 = arith.subf %86, %6 : vector<8x128xf32>
    %cst_30 = arith.constant -2.000000e+01 : f32
    %88 = vector.broadcast %cst_30 : f32 to vector<8x128xf32>
    %89 = arith.addf %6, %88 : vector<8x128xf32>
    %90 = arith.minimumf %87, %89 : vector<8x128xf32>
    %cst_31 = arith.constant 0.000000e+00 : f32
    %91 = vector.broadcast %cst_31 : f32 to vector<8x128xf32>
    %92 = arith.maximumf %90, %91 : vector<8x128xf32>
    %c3_i32 = arith.constant 3 : i32
    %93 = vector.broadcast %c3_i32 : i32 to vector<1x25xi32>
    %94 = arith.cmpi eq, %12, %93 : vector<1x25xi32>
    %95 = arith.extui %94 : vector<1x25xi1> to vector<1x25xi32>
    %96 = arith.sitofp %95 : vector<1x25xi32> to vector<1x25xf32>
    %cst_32 = arith.constant dense<0.000000e+00> : vector<8xf32>
    %97 = vector.multi_reduction <add>, %92, %cst_32 [1] : vector<8x128xf32> to vector<8xf32>
    %98 = vector.shape_cast %97 : vector<8xf32> to vector<8x1xf32>
    %99 = vector.broadcast %98 : vector<8x1xf32> to vector<8x25xf32>
    %100 = vector.broadcast %96 : vector<1x25xf32> to vector<8x25xf32>
    %101 = arith.mulf %99, %100 : vector<8x25xf32>
    %102 = arith.addf %78, %101 : vector<8x25xf32>
    %103 = arith.mulf %92, %4 : vector<8x128xf32>
    %cst_33 = arith.constant dense<0.000000e+00> : vector<8xf32>
    %104 = vector.multi_reduction <add>, %103, %cst_33 [1] : vector<8x128xf32> to vector<8xf32>
    %105 = vector.shape_cast %104 : vector<8xf32> to vector<8x1xf32>
    %106 = vector.broadcast %105 : vector<8x1xf32> to vector<8x25xf32>
    %107 = vector.broadcast %96 : vector<1x25xf32> to vector<8x25xf32>
    %108 = arith.mulf %106, %107 : vector<8x25xf32>
    %109 = arith.addf %85, %108 : vector<8x25xf32>
    %cst_34 = arith.constant 2.100000e+01 : f32
    %110 = vector.broadcast %cst_34 : f32 to vector<8x128xf32>
    %111 = arith.subf %110, %6 : vector<8x128xf32>
    %cst_35 = arith.constant -1.900000e+01 : f32
    %112 = vector.broadcast %cst_35 : f32 to vector<8x128xf32>
    %113 = arith.addf %6, %112 : vector<8x128xf32>
    %114 = arith.minimumf %111, %113 : vector<8x128xf32>
    %cst_36 = arith.constant 0.000000e+00 : f32
    %115 = vector.broadcast %cst_36 : f32 to vector<8x128xf32>
    %116 = arith.maximumf %114, %115 : vector<8x128xf32>
    %c4_i32 = arith.constant 4 : i32
    %117 = vector.broadcast %c4_i32 : i32 to vector<1x25xi32>
    %118 = arith.cmpi eq, %12, %117 : vector<1x25xi32>
    %119 = arith.extui %118 : vector<1x25xi1> to vector<1x25xi32>
    %120 = arith.sitofp %119 : vector<1x25xi32> to vector<1x25xf32>
    %cst_37 = arith.constant dense<0.000000e+00> : vector<8xf32>
    %121 = vector.multi_reduction <add>, %116, %cst_37 [1] : vector<8x128xf32> to vector<8xf32>
    %122 = vector.shape_cast %121 : vector<8xf32> to vector<8x1xf32>
    %123 = vector.broadcast %122 : vector<8x1xf32> to vector<8x25xf32>
    %124 = vector.broadcast %120 : vector<1x25xf32> to vector<8x25xf32>
    %125 = arith.mulf %123, %124 : vector<8x25xf32>
    %126 = arith.addf %102, %125 : vector<8x25xf32>
    %127 = arith.mulf %116, %4 : vector<8x128xf32>
    %cst_38 = arith.constant dense<0.000000e+00> : vector<8xf32>
    %128 = vector.multi_reduction <add>, %127, %cst_38 [1] : vector<8x128xf32> to vector<8xf32>
    %129 = vector.shape_cast %128 : vector<8xf32> to vector<8x1xf32>
    %130 = vector.broadcast %129 : vector<8x1xf32> to vector<8x25xf32>
    %131 = vector.broadcast %120 : vector<1x25xf32> to vector<8x25xf32>
    %132 = arith.mulf %130, %131 : vector<8x25xf32>
    %133 = arith.addf %109, %132 : vector<8x25xf32>
    %cst_39 = arith.constant 2.000000e+01 : f32
    %134 = vector.broadcast %cst_39 : f32 to vector<8x128xf32>
    %135 = arith.subf %134, %6 : vector<8x128xf32>
    %cst_40 = arith.constant -1.800000e+01 : f32
    %136 = vector.broadcast %cst_40 : f32 to vector<8x128xf32>
    %137 = arith.addf %6, %136 : vector<8x128xf32>
    %138 = arith.minimumf %135, %137 : vector<8x128xf32>
    %cst_41 = arith.constant 0.000000e+00 : f32
    %139 = vector.broadcast %cst_41 : f32 to vector<8x128xf32>
    %140 = arith.maximumf %138, %139 : vector<8x128xf32>
    %c5_i32 = arith.constant 5 : i32
    %141 = vector.broadcast %c5_i32 : i32 to vector<1x25xi32>
    %142 = arith.cmpi eq, %12, %141 : vector<1x25xi32>
    %143 = arith.extui %142 : vector<1x25xi1> to vector<1x25xi32>
    %144 = arith.sitofp %143 : vector<1x25xi32> to vector<1x25xf32>
    %cst_42 = arith.constant dense<0.000000e+00> : vector<8xf32>
    %145 = vector.multi_reduction <add>, %140, %cst_42 [1] : vector<8x128xf32> to vector<8xf32>
    %146 = vector.shape_cast %145 : vector<8xf32> to vector<8x1xf32>
    %147 = vector.broadcast %146 : vector<8x1xf32> to vector<8x25xf32>
    %148 = vector.broadcast %144 : vector<1x25xf32> to vector<8x25xf32>
    %149 = arith.mulf %147, %148 : vector<8x25xf32>
    %150 = arith.addf %126, %149 : vector<8x25xf32>
    %151 = arith.mulf %140, %4 : vector<8x128xf32>
    %cst_43 = arith.constant dense<0.000000e+00> : vector<8xf32>
    %152 = vector.multi_reduction <add>, %151, %cst_43 [1] : vector<8x128xf32> to vector<8xf32>
    %153 = vector.shape_cast %152 : vector<8xf32> to vector<8x1xf32>
    %154 = vector.broadcast %153 : vector<8x1xf32> to vector<8x25xf32>
    %155 = vector.broadcast %144 : vector<1x25xf32> to vector<8x25xf32>
    %156 = arith.mulf %154, %155 : vector<8x25xf32>
    %157 = arith.addf %133, %156 : vector<8x25xf32>
    %cst_44 = arith.constant 1.900000e+01 : f32
    %158 = vector.broadcast %cst_44 : f32 to vector<8x128xf32>
    %159 = arith.subf %158, %6 : vector<8x128xf32>
    %cst_45 = arith.constant -1.700000e+01 : f32
    %160 = vector.broadcast %cst_45 : f32 to vector<8x128xf32>
    %161 = arith.addf %6, %160 : vector<8x128xf32>
    %162 = arith.minimumf %159, %161 : vector<8x128xf32>
    %cst_46 = arith.constant 0.000000e+00 : f32
    %163 = vector.broadcast %cst_46 : f32 to vector<8x128xf32>
    %164 = arith.maximumf %162, %163 : vector<8x128xf32>
    %c6_i32 = arith.constant 6 : i32
    %165 = vector.broadcast %c6_i32 : i32 to vector<1x25xi32>
    %166 = arith.cmpi eq, %12, %165 : vector<1x25xi32>
    %167 = arith.extui %166 : vector<1x25xi1> to vector<1x25xi32>
    %168 = arith.sitofp %167 : vector<1x25xi32> to vector<1x25xf32>
    %cst_47 = arith.constant dense<0.000000e+00> : vector<8xf32>
    %169 = vector.multi_reduction <add>, %164, %cst_47 [1] : vector<8x128xf32> to vector<8xf32>
    %170 = vector.shape_cast %169 : vector<8xf32> to vector<8x1xf32>
    %171 = vector.broadcast %170 : vector<8x1xf32> to vector<8x25xf32>
    %172 = vector.broadcast %168 : vector<1x25xf32> to vector<8x25xf32>
    %173 = arith.mulf %171, %172 : vector<8x25xf32>
    %174 = arith.addf %150, %173 : vector<8x25xf32>
    %175 = arith.mulf %164, %4 : vector<8x128xf32>
    %cst_48 = arith.constant dense<0.000000e+00> : vector<8xf32>
    %176 = vector.multi_reduction <add>, %175, %cst_48 [1] : vector<8x128xf32> to vector<8xf32>
    %177 = vector.shape_cast %176 : vector<8xf32> to vector<8x1xf32>
    %178 = vector.broadcast %177 : vector<8x1xf32> to vector<8x25xf32>
    %179 = vector.broadcast %168 : vector<1x25xf32> to vector<8x25xf32>
    %180 = arith.mulf %178, %179 : vector<8x25xf32>
    %181 = arith.addf %157, %180 : vector<8x25xf32>
    %cst_49 = arith.constant 1.800000e+01 : f32
    %182 = vector.broadcast %cst_49 : f32 to vector<8x128xf32>
    %183 = arith.subf %182, %6 : vector<8x128xf32>
    %cst_50 = arith.constant -1.600000e+01 : f32
    %184 = vector.broadcast %cst_50 : f32 to vector<8x128xf32>
    %185 = arith.addf %6, %184 : vector<8x128xf32>
    %186 = arith.minimumf %183, %185 : vector<8x128xf32>
    %cst_51 = arith.constant 0.000000e+00 : f32
    %187 = vector.broadcast %cst_51 : f32 to vector<8x128xf32>
    %188 = arith.maximumf %186, %187 : vector<8x128xf32>
    %c7_i32 = arith.constant 7 : i32
    %189 = vector.broadcast %c7_i32 : i32 to vector<1x25xi32>
    %190 = arith.cmpi eq, %12, %189 : vector<1x25xi32>
    %191 = arith.extui %190 : vector<1x25xi1> to vector<1x25xi32>
    %192 = arith.sitofp %191 : vector<1x25xi32> to vector<1x25xf32>
    %cst_52 = arith.constant dense<0.000000e+00> : vector<8xf32>
    %193 = vector.multi_reduction <add>, %188, %cst_52 [1] : vector<8x128xf32> to vector<8xf32>
    %194 = vector.shape_cast %193 : vector<8xf32> to vector<8x1xf32>
    %195 = vector.broadcast %194 : vector<8x1xf32> to vector<8x25xf32>
    %196 = vector.broadcast %192 : vector<1x25xf32> to vector<8x25xf32>
    %197 = arith.mulf %195, %196 : vector<8x25xf32>
    %198 = arith.addf %174, %197 : vector<8x25xf32>
    %199 = arith.mulf %188, %4 : vector<8x128xf32>
    %cst_53 = arith.constant dense<0.000000e+00> : vector<8xf32>
    %200 = vector.multi_reduction <add>, %199, %cst_53 [1] : vector<8x128xf32> to vector<8xf32>
    %201 = vector.shape_cast %200 : vector<8xf32> to vector<8x1xf32>
    %202 = vector.broadcast %201 : vector<8x1xf32> to vector<8x25xf32>
    %203 = vector.broadcast %192 : vector<1x25xf32> to vector<8x25xf32>
    %204 = arith.mulf %202, %203 : vector<8x25xf32>
    %205 = arith.addf %181, %204 : vector<8x25xf32>
    %cst_54 = arith.constant 1.700000e+01 : f32
    %206 = vector.broadcast %cst_54 : f32 to vector<8x128xf32>
    %207 = arith.subf %206, %6 : vector<8x128xf32>
    %cst_55 = arith.constant -1.500000e+01 : f32
    %208 = vector.broadcast %cst_55 : f32 to vector<8x128xf32>
    %209 = arith.addf %6, %208 : vector<8x128xf32>
    %210 = arith.minimumf %207, %209 : vector<8x128xf32>
    %cst_56 = arith.constant 0.000000e+00 : f32
    %211 = vector.broadcast %cst_56 : f32 to vector<8x128xf32>
    %212 = arith.maximumf %210, %211 : vector<8x128xf32>
    %c8_i32 = arith.constant 8 : i32
    %213 = vector.broadcast %c8_i32 : i32 to vector<1x25xi32>
    %214 = arith.cmpi eq, %12, %213 : vector<1x25xi32>
    %215 = arith.extui %214 : vector<1x25xi1> to vector<1x25xi32>
    %216 = arith.sitofp %215 : vector<1x25xi32> to vector<1x25xf32>
    %cst_57 = arith.constant dense<0.000000e+00> : vector<8xf32>
    %217 = vector.multi_reduction <add>, %212, %cst_57 [1] : vector<8x128xf32> to vector<8xf32>
    %218 = vector.shape_cast %217 : vector<8xf32> to vector<8x1xf32>
    %219 = vector.broadcast %218 : vector<8x1xf32> to vector<8x25xf32>
    %220 = vector.broadcast %216 : vector<1x25xf32> to vector<8x25xf32>
    %221 = arith.mulf %219, %220 : vector<8x25xf32>
    %222 = arith.addf %198, %221 : vector<8x25xf32>
    %223 = arith.mulf %212, %4 : vector<8x128xf32>
    %cst_58 = arith.constant dense<0.000000e+00> : vector<8xf32>
    %224 = vector.multi_reduction <add>, %223, %cst_58 [1] : vector<8x128xf32> to vector<8xf32>
    %225 = vector.shape_cast %224 : vector<8xf32> to vector<8x1xf32>
    %226 = vector.broadcast %225 : vector<8x1xf32> to vector<8x25xf32>
    %227 = vector.broadcast %216 : vector<1x25xf32> to vector<8x25xf32>
    %228 = arith.mulf %226, %227 : vector<8x25xf32>
    %229 = arith.addf %205, %228 : vector<8x25xf32>
    %cst_59 = arith.constant 1.600000e+01 : f32
    %230 = vector.broadcast %cst_59 : f32 to vector<8x128xf32>
    %231 = arith.subf %230, %6 : vector<8x128xf32>
    %cst_60 = arith.constant -1.400000e+01 : f32
    %232 = vector.broadcast %cst_60 : f32 to vector<8x128xf32>
    %233 = arith.addf %6, %232 : vector<8x128xf32>
    %234 = arith.minimumf %231, %233 : vector<8x128xf32>
    %cst_61 = arith.constant 0.000000e+00 : f32
    %235 = vector.broadcast %cst_61 : f32 to vector<8x128xf32>
    %236 = arith.maximumf %234, %235 : vector<8x128xf32>
    %c9_i32 = arith.constant 9 : i32
    %237 = vector.broadcast %c9_i32 : i32 to vector<1x25xi32>
    %238 = arith.cmpi eq, %12, %237 : vector<1x25xi32>
    %239 = arith.extui %238 : vector<1x25xi1> to vector<1x25xi32>
    %240 = arith.sitofp %239 : vector<1x25xi32> to vector<1x25xf32>
    %cst_62 = arith.constant dense<0.000000e+00> : vector<8xf32>
    %241 = vector.multi_reduction <add>, %236, %cst_62 [1] : vector<8x128xf32> to vector<8xf32>
    %242 = vector.shape_cast %241 : vector<8xf32> to vector<8x1xf32>
    %243 = vector.broadcast %242 : vector<8x1xf32> to vector<8x25xf32>
    %244 = vector.broadcast %240 : vector<1x25xf32> to vector<8x25xf32>
    %245 = arith.mulf %243, %244 : vector<8x25xf32>
    %246 = arith.addf %222, %245 : vector<8x25xf32>
    %247 = arith.mulf %236, %4 : vector<8x128xf32>
    %cst_63 = arith.constant dense<0.000000e+00> : vector<8xf32>
    %248 = vector.multi_reduction <add>, %247, %cst_63 [1] : vector<8x128xf32> to vector<8xf32>
    %249 = vector.shape_cast %248 : vector<8xf32> to vector<8x1xf32>
    %250 = vector.broadcast %249 : vector<8x1xf32> to vector<8x25xf32>
    %251 = vector.broadcast %240 : vector<1x25xf32> to vector<8x25xf32>
    %252 = arith.mulf %250, %251 : vector<8x25xf32>
    %253 = arith.addf %229, %252 : vector<8x25xf32>
    %cst_64 = arith.constant 1.500000e+01 : f32
    %254 = vector.broadcast %cst_64 : f32 to vector<8x128xf32>
    %255 = arith.subf %254, %6 : vector<8x128xf32>
    %cst_65 = arith.constant -1.300000e+01 : f32
    %256 = vector.broadcast %cst_65 : f32 to vector<8x128xf32>
    %257 = arith.addf %6, %256 : vector<8x128xf32>
    %258 = arith.minimumf %255, %257 : vector<8x128xf32>
    %cst_66 = arith.constant 0.000000e+00 : f32
    %259 = vector.broadcast %cst_66 : f32 to vector<8x128xf32>
    %260 = arith.maximumf %258, %259 : vector<8x128xf32>
    %c10_i32 = arith.constant 10 : i32
    %261 = vector.broadcast %c10_i32 : i32 to vector<1x25xi32>
    %262 = arith.cmpi eq, %12, %261 : vector<1x25xi32>
    %263 = arith.extui %262 : vector<1x25xi1> to vector<1x25xi32>
    %264 = arith.sitofp %263 : vector<1x25xi32> to vector<1x25xf32>
    %cst_67 = arith.constant dense<0.000000e+00> : vector<8xf32>
    %265 = vector.multi_reduction <add>, %260, %cst_67 [1] : vector<8x128xf32> to vector<8xf32>
    %266 = vector.shape_cast %265 : vector<8xf32> to vector<8x1xf32>
    %267 = vector.broadcast %266 : vector<8x1xf32> to vector<8x25xf32>
    %268 = vector.broadcast %264 : vector<1x25xf32> to vector<8x25xf32>
    %269 = arith.mulf %267, %268 : vector<8x25xf32>
    %270 = arith.addf %246, %269 : vector<8x25xf32>
    %271 = arith.mulf %260, %4 : vector<8x128xf32>
    %cst_68 = arith.constant dense<0.000000e+00> : vector<8xf32>
    %272 = vector.multi_reduction <add>, %271, %cst_68 [1] : vector<8x128xf32> to vector<8xf32>
    %273 = vector.shape_cast %272 : vector<8xf32> to vector<8x1xf32>
    %274 = vector.broadcast %273 : vector<8x1xf32> to vector<8x25xf32>
    %275 = vector.broadcast %264 : vector<1x25xf32> to vector<8x25xf32>
    %276 = arith.mulf %274, %275 : vector<8x25xf32>
    %277 = arith.addf %253, %276 : vector<8x25xf32>
    %cst_69 = arith.constant 1.400000e+01 : f32
    %278 = vector.broadcast %cst_69 : f32 to vector<8x128xf32>
    %279 = arith.subf %278, %6 : vector<8x128xf32>
    %cst_70 = arith.constant -1.200000e+01 : f32
    %280 = vector.broadcast %cst_70 : f32 to vector<8x128xf32>
    %281 = arith.addf %6, %280 : vector<8x128xf32>
    %282 = arith.minimumf %279, %281 : vector<8x128xf32>
    %cst_71 = arith.constant 0.000000e+00 : f32
    %283 = vector.broadcast %cst_71 : f32 to vector<8x128xf32>
    %284 = arith.maximumf %282, %283 : vector<8x128xf32>
    %c11_i32 = arith.constant 11 : i32
    %285 = vector.broadcast %c11_i32 : i32 to vector<1x25xi32>
    %286 = arith.cmpi eq, %12, %285 : vector<1x25xi32>
    %287 = arith.extui %286 : vector<1x25xi1> to vector<1x25xi32>
    %288 = arith.sitofp %287 : vector<1x25xi32> to vector<1x25xf32>
    %cst_72 = arith.constant dense<0.000000e+00> : vector<8xf32>
    %289 = vector.multi_reduction <add>, %284, %cst_72 [1] : vector<8x128xf32> to vector<8xf32>
    %290 = vector.shape_cast %289 : vector<8xf32> to vector<8x1xf32>
    %291 = vector.broadcast %290 : vector<8x1xf32> to vector<8x25xf32>
    %292 = vector.broadcast %288 : vector<1x25xf32> to vector<8x25xf32>
    %293 = arith.mulf %291, %292 : vector<8x25xf32>
    %294 = arith.addf %270, %293 : vector<8x25xf32>
    %295 = arith.mulf %284, %4 : vector<8x128xf32>
    %cst_73 = arith.constant dense<0.000000e+00> : vector<8xf32>
    %296 = vector.multi_reduction <add>, %295, %cst_73 [1] : vector<8x128xf32> to vector<8xf32>
    %297 = vector.shape_cast %296 : vector<8xf32> to vector<8x1xf32>
    %298 = vector.broadcast %297 : vector<8x1xf32> to vector<8x25xf32>
    %299 = vector.broadcast %288 : vector<1x25xf32> to vector<8x25xf32>
    %300 = arith.mulf %298, %299 : vector<8x25xf32>
    %301 = arith.addf %277, %300 : vector<8x25xf32>
    %cst_74 = arith.constant 1.300000e+01 : f32
    %302 = vector.broadcast %cst_74 : f32 to vector<8x128xf32>
    %303 = arith.subf %302, %6 : vector<8x128xf32>
    %cst_75 = arith.constant -1.100000e+01 : f32
    %304 = vector.broadcast %cst_75 : f32 to vector<8x128xf32>
    %305 = arith.addf %6, %304 : vector<8x128xf32>
    %306 = arith.minimumf %303, %305 : vector<8x128xf32>
    %cst_76 = arith.constant 0.000000e+00 : f32
    %307 = vector.broadcast %cst_76 : f32 to vector<8x128xf32>
    %308 = arith.maximumf %306, %307 : vector<8x128xf32>
    %c12_i32 = arith.constant 12 : i32
    %309 = vector.broadcast %c12_i32 : i32 to vector<1x25xi32>
    %310 = arith.cmpi eq, %12, %309 : vector<1x25xi32>
    %311 = arith.extui %310 : vector<1x25xi1> to vector<1x25xi32>
    %312 = arith.sitofp %311 : vector<1x25xi32> to vector<1x25xf32>
    %cst_77 = arith.constant dense<0.000000e+00> : vector<8xf32>
    %313 = vector.multi_reduction <add>, %308, %cst_77 [1] : vector<8x128xf32> to vector<8xf32>
    %314 = vector.shape_cast %313 : vector<8xf32> to vector<8x1xf32>
    %315 = vector.broadcast %314 : vector<8x1xf32> to vector<8x25xf32>
    %316 = vector.broadcast %312 : vector<1x25xf32> to vector<8x25xf32>
    %317 = arith.mulf %315, %316 : vector<8x25xf32>
    %318 = arith.addf %294, %317 : vector<8x25xf32>
    %319 = arith.mulf %308, %4 : vector<8x128xf32>
    %cst_78 = arith.constant dense<0.000000e+00> : vector<8xf32>
    %320 = vector.multi_reduction <add>, %319, %cst_78 [1] : vector<8x128xf32> to vector<8xf32>
    %321 = vector.shape_cast %320 : vector<8xf32> to vector<8x1xf32>
    %322 = vector.broadcast %321 : vector<8x1xf32> to vector<8x25xf32>
    %323 = vector.broadcast %312 : vector<1x25xf32> to vector<8x25xf32>
    %324 = arith.mulf %322, %323 : vector<8x25xf32>
    %325 = arith.addf %301, %324 : vector<8x25xf32>
    %cst_79 = arith.constant 1.200000e+01 : f32
    %326 = vector.broadcast %cst_79 : f32 to vector<8x128xf32>
    %327 = arith.subf %326, %6 : vector<8x128xf32>
    %cst_80 = arith.constant -1.000000e+01 : f32
    %328 = vector.broadcast %cst_80 : f32 to vector<8x128xf32>
    %329 = arith.addf %6, %328 : vector<8x128xf32>
    %330 = arith.minimumf %327, %329 : vector<8x128xf32>
    %cst_81 = arith.constant 0.000000e+00 : f32
    %331 = vector.broadcast %cst_81 : f32 to vector<8x128xf32>
    %332 = arith.maximumf %330, %331 : vector<8x128xf32>
    %c13_i32 = arith.constant 13 : i32
    %333 = vector.broadcast %c13_i32 : i32 to vector<1x25xi32>
    %334 = arith.cmpi eq, %12, %333 : vector<1x25xi32>
    %335 = arith.extui %334 : vector<1x25xi1> to vector<1x25xi32>
    %336 = arith.sitofp %335 : vector<1x25xi32> to vector<1x25xf32>
    %cst_82 = arith.constant dense<0.000000e+00> : vector<8xf32>
    %337 = vector.multi_reduction <add>, %332, %cst_82 [1] : vector<8x128xf32> to vector<8xf32>
    %338 = vector.shape_cast %337 : vector<8xf32> to vector<8x1xf32>
    %339 = vector.broadcast %338 : vector<8x1xf32> to vector<8x25xf32>
    %340 = vector.broadcast %336 : vector<1x25xf32> to vector<8x25xf32>
    %341 = arith.mulf %339, %340 : vector<8x25xf32>
    %342 = arith.addf %318, %341 : vector<8x25xf32>
    %343 = arith.mulf %332, %4 : vector<8x128xf32>
    %cst_83 = arith.constant dense<0.000000e+00> : vector<8xf32>
    %344 = vector.multi_reduction <add>, %343, %cst_83 [1] : vector<8x128xf32> to vector<8xf32>
    %345 = vector.shape_cast %344 : vector<8xf32> to vector<8x1xf32>
    %346 = vector.broadcast %345 : vector<8x1xf32> to vector<8x25xf32>
    %347 = vector.broadcast %336 : vector<1x25xf32> to vector<8x25xf32>
    %348 = arith.mulf %346, %347 : vector<8x25xf32>
    %349 = arith.addf %325, %348 : vector<8x25xf32>
    %cst_84 = arith.constant 1.100000e+01 : f32
    %350 = vector.broadcast %cst_84 : f32 to vector<8x128xf32>
    %351 = arith.subf %350, %6 : vector<8x128xf32>
    %cst_85 = arith.constant -9.000000e+00 : f32
    %352 = vector.broadcast %cst_85 : f32 to vector<8x128xf32>
    %353 = arith.addf %6, %352 : vector<8x128xf32>
    %354 = arith.minimumf %351, %353 : vector<8x128xf32>
    %cst_86 = arith.constant 0.000000e+00 : f32
    %355 = vector.broadcast %cst_86 : f32 to vector<8x128xf32>
    %356 = arith.maximumf %354, %355 : vector<8x128xf32>
    %c14_i32 = arith.constant 14 : i32
    %357 = vector.broadcast %c14_i32 : i32 to vector<1x25xi32>
    %358 = arith.cmpi eq, %12, %357 : vector<1x25xi32>
    %359 = arith.extui %358 : vector<1x25xi1> to vector<1x25xi32>
    %360 = arith.sitofp %359 : vector<1x25xi32> to vector<1x25xf32>
    %cst_87 = arith.constant dense<0.000000e+00> : vector<8xf32>
    %361 = vector.multi_reduction <add>, %356, %cst_87 [1] : vector<8x128xf32> to vector<8xf32>
    %362 = vector.shape_cast %361 : vector<8xf32> to vector<8x1xf32>
    %363 = vector.broadcast %362 : vector<8x1xf32> to vector<8x25xf32>
    %364 = vector.broadcast %360 : vector<1x25xf32> to vector<8x25xf32>
    %365 = arith.mulf %363, %364 : vector<8x25xf32>
    %366 = arith.addf %342, %365 : vector<8x25xf32>
    %367 = arith.mulf %356, %4 : vector<8x128xf32>
    %cst_88 = arith.constant dense<0.000000e+00> : vector<8xf32>
    %368 = vector.multi_reduction <add>, %367, %cst_88 [1] : vector<8x128xf32> to vector<8xf32>
    %369 = vector.shape_cast %368 : vector<8xf32> to vector<8x1xf32>
    %370 = vector.broadcast %369 : vector<8x1xf32> to vector<8x25xf32>
    %371 = vector.broadcast %360 : vector<1x25xf32> to vector<8x25xf32>
    %372 = arith.mulf %370, %371 : vector<8x25xf32>
    %373 = arith.addf %349, %372 : vector<8x25xf32>
    %cst_89 = arith.constant 1.000000e+01 : f32
    %374 = vector.broadcast %cst_89 : f32 to vector<8x128xf32>
    %375 = arith.subf %374, %6 : vector<8x128xf32>
    %cst_90 = arith.constant -8.000000e+00 : f32
    %376 = vector.broadcast %cst_90 : f32 to vector<8x128xf32>
    %377 = arith.addf %6, %376 : vector<8x128xf32>
    %378 = arith.minimumf %375, %377 : vector<8x128xf32>
    %cst_91 = arith.constant 0.000000e+00 : f32
    %379 = vector.broadcast %cst_91 : f32 to vector<8x128xf32>
    %380 = arith.maximumf %378, %379 : vector<8x128xf32>
    %c15_i32 = arith.constant 15 : i32
    %381 = vector.broadcast %c15_i32 : i32 to vector<1x25xi32>
    %382 = arith.cmpi eq, %12, %381 : vector<1x25xi32>
    %383 = arith.extui %382 : vector<1x25xi1> to vector<1x25xi32>
    %384 = arith.sitofp %383 : vector<1x25xi32> to vector<1x25xf32>
    %cst_92 = arith.constant dense<0.000000e+00> : vector<8xf32>
    %385 = vector.multi_reduction <add>, %380, %cst_92 [1] : vector<8x128xf32> to vector<8xf32>
    %386 = vector.shape_cast %385 : vector<8xf32> to vector<8x1xf32>
    %387 = vector.broadcast %386 : vector<8x1xf32> to vector<8x25xf32>
    %388 = vector.broadcast %384 : vector<1x25xf32> to vector<8x25xf32>
    %389 = arith.mulf %387, %388 : vector<8x25xf32>
    %390 = arith.addf %366, %389 : vector<8x25xf32>
    %391 = arith.mulf %380, %4 : vector<8x128xf32>
    %cst_93 = arith.constant dense<0.000000e+00> : vector<8xf32>
    %392 = vector.multi_reduction <add>, %391, %cst_93 [1] : vector<8x128xf32> to vector<8xf32>
    %393 = vector.shape_cast %392 : vector<8xf32> to vector<8x1xf32>
    %394 = vector.broadcast %393 : vector<8x1xf32> to vector<8x25xf32>
    %395 = vector.broadcast %384 : vector<1x25xf32> to vector<8x25xf32>
    %396 = arith.mulf %394, %395 : vector<8x25xf32>
    %397 = arith.addf %373, %396 : vector<8x25xf32>
    %cst_94 = arith.constant 9.000000e+00 : f32
    %398 = vector.broadcast %cst_94 : f32 to vector<8x128xf32>
    %399 = arith.subf %398, %6 : vector<8x128xf32>
    %cst_95 = arith.constant -7.000000e+00 : f32
    %400 = vector.broadcast %cst_95 : f32 to vector<8x128xf32>
    %401 = arith.addf %6, %400 : vector<8x128xf32>
    %402 = arith.minimumf %399, %401 : vector<8x128xf32>
    %cst_96 = arith.constant 0.000000e+00 : f32
    %403 = vector.broadcast %cst_96 : f32 to vector<8x128xf32>
    %404 = arith.maximumf %402, %403 : vector<8x128xf32>
    %c16_i32 = arith.constant 16 : i32
    %405 = vector.broadcast %c16_i32 : i32 to vector<1x25xi32>
    %406 = arith.cmpi eq, %12, %405 : vector<1x25xi32>
    %407 = arith.extui %406 : vector<1x25xi1> to vector<1x25xi32>
    %408 = arith.sitofp %407 : vector<1x25xi32> to vector<1x25xf32>
    %cst_97 = arith.constant dense<0.000000e+00> : vector<8xf32>
    %409 = vector.multi_reduction <add>, %404, %cst_97 [1] : vector<8x128xf32> to vector<8xf32>
    %410 = vector.shape_cast %409 : vector<8xf32> to vector<8x1xf32>
    %411 = vector.broadcast %410 : vector<8x1xf32> to vector<8x25xf32>
    %412 = vector.broadcast %408 : vector<1x25xf32> to vector<8x25xf32>
    %413 = arith.mulf %411, %412 : vector<8x25xf32>
    %414 = arith.addf %390, %413 : vector<8x25xf32>
    %415 = arith.mulf %404, %4 : vector<8x128xf32>
    %cst_98 = arith.constant dense<0.000000e+00> : vector<8xf32>
    %416 = vector.multi_reduction <add>, %415, %cst_98 [1] : vector<8x128xf32> to vector<8xf32>
    %417 = vector.shape_cast %416 : vector<8xf32> to vector<8x1xf32>
    %418 = vector.broadcast %417 : vector<8x1xf32> to vector<8x25xf32>
    %419 = vector.broadcast %408 : vector<1x25xf32> to vector<8x25xf32>
    %420 = arith.mulf %418, %419 : vector<8x25xf32>
    %421 = arith.addf %397, %420 : vector<8x25xf32>
    %cst_99 = arith.constant 8.000000e+00 : f32
    %422 = vector.broadcast %cst_99 : f32 to vector<8x128xf32>
    %423 = arith.subf %422, %6 : vector<8x128xf32>
    %cst_100 = arith.constant -6.000000e+00 : f32
    %424 = vector.broadcast %cst_100 : f32 to vector<8x128xf32>
    %425 = arith.addf %6, %424 : vector<8x128xf32>
    %426 = arith.minimumf %423, %425 : vector<8x128xf32>
    %cst_101 = arith.constant 0.000000e+00 : f32
    %427 = vector.broadcast %cst_101 : f32 to vector<8x128xf32>
    %428 = arith.maximumf %426, %427 : vector<8x128xf32>
    %c17_i32 = arith.constant 17 : i32
    %429 = vector.broadcast %c17_i32 : i32 to vector<1x25xi32>
    %430 = arith.cmpi eq, %12, %429 : vector<1x25xi32>
    %431 = arith.extui %430 : vector<1x25xi1> to vector<1x25xi32>
    %432 = arith.sitofp %431 : vector<1x25xi32> to vector<1x25xf32>
    %cst_102 = arith.constant dense<0.000000e+00> : vector<8xf32>
    %433 = vector.multi_reduction <add>, %428, %cst_102 [1] : vector<8x128xf32> to vector<8xf32>
    %434 = vector.shape_cast %433 : vector<8xf32> to vector<8x1xf32>
    %435 = vector.broadcast %434 : vector<8x1xf32> to vector<8x25xf32>
    %436 = vector.broadcast %432 : vector<1x25xf32> to vector<8x25xf32>
    %437 = arith.mulf %435, %436 : vector<8x25xf32>
    %438 = arith.addf %414, %437 : vector<8x25xf32>
    %439 = arith.mulf %428, %4 : vector<8x128xf32>
    %cst_103 = arith.constant dense<0.000000e+00> : vector<8xf32>
    %440 = vector.multi_reduction <add>, %439, %cst_103 [1] : vector<8x128xf32> to vector<8xf32>
    %441 = vector.shape_cast %440 : vector<8xf32> to vector<8x1xf32>
    %442 = vector.broadcast %441 : vector<8x1xf32> to vector<8x25xf32>
    %443 = vector.broadcast %432 : vector<1x25xf32> to vector<8x25xf32>
    %444 = arith.mulf %442, %443 : vector<8x25xf32>
    %445 = arith.addf %421, %444 : vector<8x25xf32>
    %cst_104 = arith.constant 7.000000e+00 : f32
    %446 = vector.broadcast %cst_104 : f32 to vector<8x128xf32>
    %447 = arith.subf %446, %6 : vector<8x128xf32>
    %cst_105 = arith.constant -5.000000e+00 : f32
    %448 = vector.broadcast %cst_105 : f32 to vector<8x128xf32>
    %449 = arith.addf %6, %448 : vector<8x128xf32>
    %450 = arith.minimumf %447, %449 : vector<8x128xf32>
    %cst_106 = arith.constant 0.000000e+00 : f32
    %451 = vector.broadcast %cst_106 : f32 to vector<8x128xf32>
    %452 = arith.maximumf %450, %451 : vector<8x128xf32>
    %c18_i32 = arith.constant 18 : i32
    %453 = vector.broadcast %c18_i32 : i32 to vector<1x25xi32>
    %454 = arith.cmpi eq, %12, %453 : vector<1x25xi32>
    %455 = arith.extui %454 : vector<1x25xi1> to vector<1x25xi32>
    %456 = arith.sitofp %455 : vector<1x25xi32> to vector<1x25xf32>
    %cst_107 = arith.constant dense<0.000000e+00> : vector<8xf32>
    %457 = vector.multi_reduction <add>, %452, %cst_107 [1] : vector<8x128xf32> to vector<8xf32>
    %458 = vector.shape_cast %457 : vector<8xf32> to vector<8x1xf32>
    %459 = vector.broadcast %458 : vector<8x1xf32> to vector<8x25xf32>
    %460 = vector.broadcast %456 : vector<1x25xf32> to vector<8x25xf32>
    %461 = arith.mulf %459, %460 : vector<8x25xf32>
    %462 = arith.addf %438, %461 : vector<8x25xf32>
    %463 = arith.mulf %452, %4 : vector<8x128xf32>
    %cst_108 = arith.constant dense<0.000000e+00> : vector<8xf32>
    %464 = vector.multi_reduction <add>, %463, %cst_108 [1] : vector<8x128xf32> to vector<8xf32>
    %465 = vector.shape_cast %464 : vector<8xf32> to vector<8x1xf32>
    %466 = vector.broadcast %465 : vector<8x1xf32> to vector<8x25xf32>
    %467 = vector.broadcast %456 : vector<1x25xf32> to vector<8x25xf32>
    %468 = arith.mulf %466, %467 : vector<8x25xf32>
    %469 = arith.addf %445, %468 : vector<8x25xf32>
    %cst_109 = arith.constant 6.000000e+00 : f32
    %470 = vector.broadcast %cst_109 : f32 to vector<8x128xf32>
    %471 = arith.subf %470, %6 : vector<8x128xf32>
    %cst_110 = arith.constant -4.000000e+00 : f32
    %472 = vector.broadcast %cst_110 : f32 to vector<8x128xf32>
    %473 = arith.addf %6, %472 : vector<8x128xf32>
    %474 = arith.minimumf %471, %473 : vector<8x128xf32>
    %cst_111 = arith.constant 0.000000e+00 : f32
    %475 = vector.broadcast %cst_111 : f32 to vector<8x128xf32>
    %476 = arith.maximumf %474, %475 : vector<8x128xf32>
    %c19_i32 = arith.constant 19 : i32
    %477 = vector.broadcast %c19_i32 : i32 to vector<1x25xi32>
    %478 = arith.cmpi eq, %12, %477 : vector<1x25xi32>
    %479 = arith.extui %478 : vector<1x25xi1> to vector<1x25xi32>
    %480 = arith.sitofp %479 : vector<1x25xi32> to vector<1x25xf32>
    %cst_112 = arith.constant dense<0.000000e+00> : vector<8xf32>
    %481 = vector.multi_reduction <add>, %476, %cst_112 [1] : vector<8x128xf32> to vector<8xf32>
    %482 = vector.shape_cast %481 : vector<8xf32> to vector<8x1xf32>
    %483 = vector.broadcast %482 : vector<8x1xf32> to vector<8x25xf32>
    %484 = vector.broadcast %480 : vector<1x25xf32> to vector<8x25xf32>
    %485 = arith.mulf %483, %484 : vector<8x25xf32>
    %486 = arith.addf %462, %485 : vector<8x25xf32>
    %487 = arith.mulf %476, %4 : vector<8x128xf32>
    %cst_113 = arith.constant dense<0.000000e+00> : vector<8xf32>
    %488 = vector.multi_reduction <add>, %487, %cst_113 [1] : vector<8x128xf32> to vector<8xf32>
    %489 = vector.shape_cast %488 : vector<8xf32> to vector<8x1xf32>
    %490 = vector.broadcast %489 : vector<8x1xf32> to vector<8x25xf32>
    %491 = vector.broadcast %480 : vector<1x25xf32> to vector<8x25xf32>
    %492 = arith.mulf %490, %491 : vector<8x25xf32>
    %493 = arith.addf %469, %492 : vector<8x25xf32>
    %cst_114 = arith.constant 5.000000e+00 : f32
    %494 = vector.broadcast %cst_114 : f32 to vector<8x128xf32>
    %495 = arith.subf %494, %6 : vector<8x128xf32>
    %cst_115 = arith.constant -3.000000e+00 : f32
    %496 = vector.broadcast %cst_115 : f32 to vector<8x128xf32>
    %497 = arith.addf %6, %496 : vector<8x128xf32>
    %498 = arith.minimumf %495, %497 : vector<8x128xf32>
    %cst_116 = arith.constant 0.000000e+00 : f32
    %499 = vector.broadcast %cst_116 : f32 to vector<8x128xf32>
    %500 = arith.maximumf %498, %499 : vector<8x128xf32>
    %c20_i32 = arith.constant 20 : i32
    %501 = vector.broadcast %c20_i32 : i32 to vector<1x25xi32>
    %502 = arith.cmpi eq, %12, %501 : vector<1x25xi32>
    %503 = arith.extui %502 : vector<1x25xi1> to vector<1x25xi32>
    %504 = arith.sitofp %503 : vector<1x25xi32> to vector<1x25xf32>
    %cst_117 = arith.constant dense<0.000000e+00> : vector<8xf32>
    %505 = vector.multi_reduction <add>, %500, %cst_117 [1] : vector<8x128xf32> to vector<8xf32>
    %506 = vector.shape_cast %505 : vector<8xf32> to vector<8x1xf32>
    %507 = vector.broadcast %506 : vector<8x1xf32> to vector<8x25xf32>
    %508 = vector.broadcast %504 : vector<1x25xf32> to vector<8x25xf32>
    %509 = arith.mulf %507, %508 : vector<8x25xf32>
    %510 = arith.addf %486, %509 : vector<8x25xf32>
    %511 = arith.mulf %500, %4 : vector<8x128xf32>
    %cst_118 = arith.constant dense<0.000000e+00> : vector<8xf32>
    %512 = vector.multi_reduction <add>, %511, %cst_118 [1] : vector<8x128xf32> to vector<8xf32>
    %513 = vector.shape_cast %512 : vector<8xf32> to vector<8x1xf32>
    %514 = vector.broadcast %513 : vector<8x1xf32> to vector<8x25xf32>
    %515 = vector.broadcast %504 : vector<1x25xf32> to vector<8x25xf32>
    %516 = arith.mulf %514, %515 : vector<8x25xf32>
    %517 = arith.addf %493, %516 : vector<8x25xf32>
    %cst_119 = arith.constant 4.000000e+00 : f32
    %518 = vector.broadcast %cst_119 : f32 to vector<8x128xf32>
    %519 = arith.subf %518, %6 : vector<8x128xf32>
    %cst_120 = arith.constant -2.000000e+00 : f32
    %520 = vector.broadcast %cst_120 : f32 to vector<8x128xf32>
    %521 = arith.addf %6, %520 : vector<8x128xf32>
    %522 = arith.minimumf %519, %521 : vector<8x128xf32>
    %cst_121 = arith.constant 0.000000e+00 : f32
    %523 = vector.broadcast %cst_121 : f32 to vector<8x128xf32>
    %524 = arith.maximumf %522, %523 : vector<8x128xf32>
    %c21_i32 = arith.constant 21 : i32
    %525 = vector.broadcast %c21_i32 : i32 to vector<1x25xi32>
    %526 = arith.cmpi eq, %12, %525 : vector<1x25xi32>
    %527 = arith.extui %526 : vector<1x25xi1> to vector<1x25xi32>
    %528 = arith.sitofp %527 : vector<1x25xi32> to vector<1x25xf32>
    %cst_122 = arith.constant dense<0.000000e+00> : vector<8xf32>
    %529 = vector.multi_reduction <add>, %524, %cst_122 [1] : vector<8x128xf32> to vector<8xf32>
    %530 = vector.shape_cast %529 : vector<8xf32> to vector<8x1xf32>
    %531 = vector.broadcast %530 : vector<8x1xf32> to vector<8x25xf32>
    %532 = vector.broadcast %528 : vector<1x25xf32> to vector<8x25xf32>
    %533 = arith.mulf %531, %532 : vector<8x25xf32>
    %534 = arith.addf %510, %533 : vector<8x25xf32>
    %535 = arith.mulf %524, %4 : vector<8x128xf32>
    %cst_123 = arith.constant dense<0.000000e+00> : vector<8xf32>
    %536 = vector.multi_reduction <add>, %535, %cst_123 [1] : vector<8x128xf32> to vector<8xf32>
    %537 = vector.shape_cast %536 : vector<8xf32> to vector<8x1xf32>
    %538 = vector.broadcast %537 : vector<8x1xf32> to vector<8x25xf32>
    %539 = vector.broadcast %528 : vector<1x25xf32> to vector<8x25xf32>
    %540 = arith.mulf %538, %539 : vector<8x25xf32>
    %541 = arith.addf %517, %540 : vector<8x25xf32>
    %cst_124 = arith.constant 3.000000e+00 : f32
    %542 = vector.broadcast %cst_124 : f32 to vector<8x128xf32>
    %543 = arith.subf %542, %6 : vector<8x128xf32>
    %cst_125 = arith.constant -1.000000e+00 : f32
    %544 = vector.broadcast %cst_125 : f32 to vector<8x128xf32>
    %545 = arith.addf %6, %544 : vector<8x128xf32>
    %546 = arith.minimumf %543, %545 : vector<8x128xf32>
    %cst_126 = arith.constant 0.000000e+00 : f32
    %547 = vector.broadcast %cst_126 : f32 to vector<8x128xf32>
    %548 = arith.maximumf %546, %547 : vector<8x128xf32>
    %c22_i32 = arith.constant 22 : i32
    %549 = vector.broadcast %c22_i32 : i32 to vector<1x25xi32>
    %550 = arith.cmpi eq, %12, %549 : vector<1x25xi32>
    %551 = arith.extui %550 : vector<1x25xi1> to vector<1x25xi32>
    %552 = arith.sitofp %551 : vector<1x25xi32> to vector<1x25xf32>
    %cst_127 = arith.constant dense<0.000000e+00> : vector<8xf32>
    %553 = vector.multi_reduction <add>, %548, %cst_127 [1] : vector<8x128xf32> to vector<8xf32>
    %554 = vector.shape_cast %553 : vector<8xf32> to vector<8x1xf32>
    %555 = vector.broadcast %554 : vector<8x1xf32> to vector<8x25xf32>
    %556 = vector.broadcast %552 : vector<1x25xf32> to vector<8x25xf32>
    %557 = arith.mulf %555, %556 : vector<8x25xf32>
    %558 = arith.addf %534, %557 : vector<8x25xf32>
    %559 = arith.mulf %548, %4 : vector<8x128xf32>
    %cst_128 = arith.constant dense<0.000000e+00> : vector<8xf32>
    %560 = vector.multi_reduction <add>, %559, %cst_128 [1] : vector<8x128xf32> to vector<8xf32>
    %561 = vector.shape_cast %560 : vector<8xf32> to vector<8x1xf32>
    %562 = vector.broadcast %561 : vector<8x1xf32> to vector<8x25xf32>
    %563 = vector.broadcast %552 : vector<1x25xf32> to vector<8x25xf32>
    %564 = arith.mulf %562, %563 : vector<8x25xf32>
    %565 = arith.addf %541, %564 : vector<8x25xf32>
    %cst_129 = arith.constant 2.000000e+00 : f32
    %566 = vector.broadcast %cst_129 : f32 to vector<8x128xf32>
    %567 = arith.subf %566, %6 : vector<8x128xf32>
    %cst_130 = arith.constant 0.000000e+00 : f32
    %568 = vector.broadcast %cst_130 : f32 to vector<8x128xf32>
    %569 = arith.addf %6, %568 : vector<8x128xf32>
    %570 = arith.minimumf %567, %569 : vector<8x128xf32>
    %cst_131 = arith.constant 0.000000e+00 : f32
    %571 = vector.broadcast %cst_131 : f32 to vector<8x128xf32>
    %572 = arith.maximumf %570, %571 : vector<8x128xf32>
    %c23_i32 = arith.constant 23 : i32
    %573 = vector.broadcast %c23_i32 : i32 to vector<1x25xi32>
    %574 = arith.cmpi eq, %12, %573 : vector<1x25xi32>
    %575 = arith.extui %574 : vector<1x25xi1> to vector<1x25xi32>
    %576 = arith.sitofp %575 : vector<1x25xi32> to vector<1x25xf32>
    %cst_132 = arith.constant dense<0.000000e+00> : vector<8xf32>
    %577 = vector.multi_reduction <add>, %572, %cst_132 [1] : vector<8x128xf32> to vector<8xf32>
    %578 = vector.shape_cast %577 : vector<8xf32> to vector<8x1xf32>
    %579 = vector.broadcast %578 : vector<8x1xf32> to vector<8x25xf32>
    %580 = vector.broadcast %576 : vector<1x25xf32> to vector<8x25xf32>
    %581 = arith.mulf %579, %580 : vector<8x25xf32>
    %582 = arith.addf %558, %581 : vector<8x25xf32>
    %583 = arith.mulf %572, %4 : vector<8x128xf32>
    %cst_133 = arith.constant dense<0.000000e+00> : vector<8xf32>
    %584 = vector.multi_reduction <add>, %583, %cst_133 [1] : vector<8x128xf32> to vector<8xf32>
    %585 = vector.shape_cast %584 : vector<8xf32> to vector<8x1xf32>
    %586 = vector.broadcast %585 : vector<8x1xf32> to vector<8x25xf32>
    %587 = vector.broadcast %576 : vector<1x25xf32> to vector<8x25xf32>
    %588 = arith.mulf %586, %587 : vector<8x25xf32>
    %589 = arith.addf %565, %588 : vector<8x25xf32>
    %cst_134 = arith.constant 1.000000e+00 : f32
    %590 = vector.broadcast %cst_134 : f32 to vector<8x128xf32>
    %591 = arith.subf %590, %6 : vector<8x128xf32>
    %cst_135 = arith.constant 1.000000e+00 : f32
    %592 = vector.broadcast %cst_135 : f32 to vector<8x128xf32>
    %593 = arith.minimumf %591, %592 : vector<8x128xf32>
    %cst_136 = arith.constant 0.000000e+00 : f32
    %594 = vector.broadcast %cst_136 : f32 to vector<8x128xf32>
    %595 = arith.maximumf %593, %594 : vector<8x128xf32>
    %c24_i32 = arith.constant 24 : i32
    %596 = vector.broadcast %c24_i32 : i32 to vector<1x25xi32>
    %597 = arith.cmpi eq, %12, %596 : vector<1x25xi32>
    %598 = arith.extui %597 : vector<1x25xi1> to vector<1x25xi32>
    %599 = arith.sitofp %598 : vector<1x25xi32> to vector<1x25xf32>
    %cst_137 = arith.constant dense<0.000000e+00> : vector<8xf32>
    %600 = vector.multi_reduction <add>, %595, %cst_137 [1] : vector<8x128xf32> to vector<8xf32>
    %601 = vector.shape_cast %600 : vector<8xf32> to vector<8x1xf32>
    %602 = vector.broadcast %601 : vector<8x1xf32> to vector<8x25xf32>
    %603 = vector.broadcast %599 : vector<1x25xf32> to vector<8x25xf32>
    %604 = arith.mulf %602, %603 : vector<8x25xf32>
    %605 = arith.addf %582, %604 : vector<8x25xf32>
    %606 = arith.mulf %595, %4 : vector<8x128xf32>
    %cst_138 = arith.constant dense<0.000000e+00> : vector<8xf32>
    %607 = vector.multi_reduction <add>, %606, %cst_138 [1] : vector<8x128xf32> to vector<8xf32>
    %608 = vector.shape_cast %607 : vector<8xf32> to vector<8x1xf32>
    %609 = vector.broadcast %608 : vector<8x1xf32> to vector<8x25xf32>
    %610 = vector.broadcast %599 : vector<1x25xf32> to vector<8x25xf32>
    %611 = arith.mulf %609, %610 : vector<8x25xf32>
    %612 = arith.addf %589, %611 : vector<8x25xf32>
    %c0_139 = arith.constant 0 : index
    %c0_140 = arith.constant 0 : index
    %613 = vector.load %arg5[%c0_139, %c0_140] : memref<8x25xf32, #tpu.memory_space<vmem>>, vector<8x25xf32>
    tpu.vector_store %arg5[%c0_139, %c0_140], %605 {strides = array<i32>} : memref<8x25xf32, #tpu.memory_space<vmem>>, vector<8x25xf32>,
    %c0_141 = arith.constant 0 : index
    %c0_142 = arith.constant 0 : index
    %614 = vector.load %arg6[%c0_141, %c0_142] : memref<8x25xf32, #tpu.memory_space<vmem>>, vector<8x25xf32>
    tpu.vector_store %arg6[%c0_141, %c0_142], %612 {strides = array<i32>} : memref<8x25xf32, #tpu.memory_space<vmem>>, vector<8x25xf32>,
    %c0_i32_143 = arith.constant 0 : i32
    %615 = arith.cmpi eq, %arg1, %c0_i32_143 : i32
    %616 = arith.extui %615 : i1 to i32
    %c0_i32_144 = arith.constant 0 : i32
    %617 = arith.cmpi ne, %616, %c0_i32_144 : i32
    scf.if %617 {
      %c0_145 = arith.constant 0 : index
      %c0_146 = arith.constant 0 : index
      %618 = vector.load %arg5[%c0_145, %c0_146] : memref<8x25xf32, #tpu.memory_space<vmem>>, vector<8x25xf32>
      %c0_147 = arith.constant 0 : index
      %c0_148 = arith.constant 0 : index
      %619 = vector.load %arg6[%c0_147, %c0_148] : memref<8x25xf32, #tpu.memory_space<vmem>>, vector<8x25xf32>
      %c0_149 = arith.constant 0 : index
      %c0_150 = arith.constant 0 : index
      %620 = vector.load %arg7[%c0_149, %c0_150] : memref<8x1xf32, #tpu.memory_space<vmem>>, vector<8x1xf32>
      %621 = tpu.iota {dimensions = array<i32: 0>} : vector<25x25xi32>
      %622 = tpu.iota {dimensions = array<i32: 1>} : vector<25x25xi32>
      %623 = arith.cmpi sle, %621, %622 : vector<25x25xi32>
      %624 = arith.extui %623 : vector<25x25xi1> to vector<25x25xi32>
      %625 = arith.sitofp %624 : vector<25x25xi32> to vector<25x25xf32>
      %cst_151 = arith.constant dense<0.000000e+00> : vector<8x25xf32>
      %626 = tpu.matmul %618, %625, %cst_151 {dimension_numbers = #tpu.dot_dimension_numbers<[1], [0], [0], [1], [0, 0, 1, 1], [], []>} : vector<8x25xf32>, vector<25x25xf32>, vector<8x25xf32> -> vector<8x25xf32>
      %cst_152 = arith.constant dense<0.000000e+00> : vector<8x25xf32>
      %627 = tpu.matmul %619, %625, %cst_152 {dimension_numbers = #tpu.dot_dimension_numbers<[1], [0], [0], [1], [0, 0, 1, 1], [], []>} : vector<8x25xf32>, vector<25x25xf32>, vector<8x25xf32> -> vector<8x25xf32>
      %628 = arith.subf %626, %618 : vector<8x25xf32>
      %629 = arith.subf %627, %619 : vector<8x25xf32>
      %cst_153 = arith.constant 1.000000e+00 : f32
      %630 = vector.broadcast %cst_153 : f32 to vector<8x25xf32>
      %631 = arith.subf %619, %630 : vector<8x25xf32>
      %cst_154 = arith.constant 0.000000e+00 : f32
      %632 = vector.broadcast %cst_154 : f32 to vector<8x25xf32>
      %633 = arith.maximumf %631, %632 : vector<8x25xf32>
      %cst_155 = arith.constant 1.000000e+00 : f32
      %634 = vector.broadcast %cst_155 : f32 to vector<8x25xf32>
      %635 = arith.subf %618, %634 : vector<8x25xf32>
      %cst_156 = arith.constant 0.000000e+00 : f32
      %636 = vector.broadcast %cst_156 : f32 to vector<8x25xf32>
      %637 = arith.maximumf %635, %636 : vector<8x25xf32>
      %cst_157 = arith.constant 9.99999993E-9 : f32
      %638 = vector.broadcast %cst_157 : f32 to vector<8x25xf32>
      %639 = arith.addf %637, %638 : vector<8x25xf32>
      %640 = tpu.reciprocal %639 : vector<8x25xf32> -> vector<8x25xf32>
      %641 = arith.mulf %633, %640 : vector<8x25xf32>
      %642 = arith.mulf %618, %641 : vector<8x25xf32>
      %cst_158 = arith.constant 1.000000e+00 : f32
      %643 = vector.broadcast %cst_158 : f32 to vector<8x25xf32>
      %644 = arith.addf %629, %643 : vector<8x25xf32>
      %cst_159 = arith.constant 1.000000e+00 : f32
      %645 = vector.broadcast %cst_159 : f32 to vector<8x25xf32>
      %646 = arith.addf %628, %645 : vector<8x25xf32>
      %647 = arith.mulf %641, %646 : vector<8x25xf32>
      %648 = arith.subf %644, %647 : vector<8x25xf32>
      %cst_160 = arith.constant 1.000000e+00 : f32
      %649 = vector.broadcast %cst_160 : f32 to vector<8x25xf32>
      %650 = arith.addf %626, %649 : vector<8x25xf32>
      %cst_161 = arith.constant 1.000000e+00 : f32
      %651 = vector.broadcast %cst_161 : f32 to vector<8x25xf32>
      %652 = arith.addf %628, %651 : vector<8x25xf32>
      %653 = arith.divf %650, %652 : vector<8x25xf32>
      %654 = math.log %653 : vector<8x25xf32>
      %655 = arith.mulf %648, %654 : vector<8x25xf32>
      %656 = arith.addf %642, %655 : vector<8x25xf32>
      %657 = arith.mulf %619, %656 : vector<8x25xf32>
      %cst_162 = arith.constant 9.99999993E-9 : f32
      %658 = vector.broadcast %cst_162 : f32 to vector<8x25xf32>
      %659 = arith.addf %618, %658 : vector<8x25xf32>
      %660 = tpu.reciprocal %659 : vector<8x25xf32> -> vector<8x25xf32>
      %661 = arith.mulf %657, %660 : vector<8x25xf32>
      %662 = tpu.reciprocal %620 : vector<8x1xf32> -> vector<8x1xf32>
      %663 = vector.broadcast %662 : vector<8x1xf32> to vector<8x25xf32>
      %664 = arith.mulf %661, %663 : vector<8x25xf32>
      %cst_163 = arith.constant dense<0.000000e+00> : vector<8xf32>
      %665 = vector.multi_reduction <add>, %664, %cst_163 [1] : vector<8x25xf32> to vector<8xf32>
      %666 = vector.shape_cast %665 : vector<8xf32> to vector<8x1xf32>
      %c0_164 = arith.constant 0 : index
      %c0_165 = arith.constant 0 : index
      %667 = vector.load %arg4[%c0_164, %c0_165] : memref<8x1xf32, #tpu.memory_space<vmem>>, vector<8x1xf32>
      tpu.vector_store %arg4[%c0_164, %c0_165], %666 {strides = array<i32>} : memref<8x1xf32, #tpu.memory_space<vmem>>, vector<8x1xf32>,
    } else {
    }
    return
  }
  func.func @transform_0(%arg0: i32, %arg1: i32) -> (i32, i32) {
    %c0_i32 = arith.constant 0 : i32
    return %arg0, %arg1 : i32, i32
  }
  func.func @transform_1(%arg0: i32, %arg1: i32) -> (i32, i32) {
    %c0_i32 = arith.constant 0 : i32
    return %arg0, %arg1 : i32, i32
  }
  func.func @transform_2(%arg0: i32, %arg1: i32) -> (i32, i32) {
    %c0_i32 = arith.constant 0 : i32
    %c0_i32_0 = arith.constant 0 : i32
    return %arg0, %c0_i32 : i32, i32
  }
}

</mosaic_0001>

<bundles_post_ra>
// kernel: tpu_custom_call.1
= control target key start
LH: loop header
LB: loop body
LE: loop exit
PB: predicated region body
PF: predicated region fallthrough
CT: control target
= control target key end

     0   :  { %7 = vsyncpa [#allocation6], 0  ;;  %s1223_s0 = inlined_call_operand.hbm [shape: f32[8,128], index: 0, kind: input, shape index: {}]   ;;  %s1224_s1 = inlined_call_operand.hbm [shape: f32[8,128], index: 1, kind: input, shape index: {}]   ;;  %s1225_s2 = inlined_call_operand.vmem [shape: f32[8,1], index: 2, kind: output, shape index: {}]  }
   0x1   :  { %8 = vsyncpa [#allocation8], 0  ;;  %s828_s9 = smov [#allocation5]   ;;  %s829_s11 = smov [#allocation7]  }
   0x2   :  { %s15_s10 = sshll.u32 %s828_s9, 4  ;;  %s25_s12 = sshll.u32 %s829_s11, 4  ;;  %s16_s10 = int_to_ptr.vmem [resolvable:$true] %s15_s10  ;;  %s26_s12 = int_to_ptr.vmem [resolvable:$true] %s25_s12 }
   0x3   :  { %s780_s15 = scalar_lea.hbm %s1223_s0, 128 }
   0x4   :  { %p781_p0 = scmp.ne.s32.totalorder %s1223_s0, %s780_s15  ;;  %p784_p1 = scmp.lt.u32.totalorder %s780_s15, %s1223_s0 }
   0x6   :  { %p786_p2 = pnand %p784_p1, %p781_p0 }
   0x8   :  { %789 = shalt.err (!%p786_p2)
}
   0x9   :  { %s790_s20 = scalar_lea.vmem %s16_s10, 128  ;;  %p795_p4 = scmp.lt.s32.totalorder %s16_s10, %s16_s10 }
   0xa   :  { %p791_p3 = scmp.ne.s32.totalorder %s16_s10, %s790_s20  ;;  %p796_p5 = scmp.lt.s32.totalorder %s790_s20, %s790_s20 }
   0xc   :  { %p797_p6 = por %p796_p5, %p795_p4 }
   0xe   :  { %p798_p7 = pnand %p797_p6, %p791_p3 }
  0x10   :  { %801 = shalt.err (!%p798_p7)
}
  0x11   :  { %18 = dma.hbm_to_vmem [thread:$0]  %s1223_s0, 128, %s16_s10, [#allocation6]  }
  0x12   :  { %s802_s25 = scalar_lea.hbm %s1224_s1, 128 }
  0x13   :  { %p803_p8 = scmp.ne.s32.totalorder %s1224_s1, %s802_s25  ;;  %p806_p9 = scmp.lt.u32.totalorder %s802_s25, %s1224_s1 }
  0x15   :  { %p808_p10 = pnand %p806_p9, %p803_p8 }
  0x17   :  { %811 = shalt.err (!%p808_p10)
}
  0x18   :  { %s812_s30 = scalar_lea.vmem %s26_s12, 128  ;;  %p817_p12 = scmp.lt.s32.totalorder %s26_s12, %s26_s12 }
  0x19   :  { %p813_p11 = scmp.ne.s32.totalorder %s26_s12, %s812_s30  ;;  %p818_p13 = scmp.lt.s32.totalorder %s812_s30, %s812_s30 }
  0x1b   :  { %p819_p0 = por %p818_p13, %p817_p12 }
  0x1d   :  { %p820_p1 = pnand %p819_p0, %p813_p11 }
  0x1f   :  { %823 = shalt.err (!%p820_p1)
}
  0x20   :  { %28 = dma.hbm_to_vmem [thread:$0]  %s1224_s1, 128, %s26_s12, [#allocation8]  }
  0x21   :  { %824 = dma.done.wait [#allocation6], 128  }
  0x22   :  { %825 = vsyncadd [#allocation6], 4294967168 }
  0x23   :  { %826 = dma.done.wait [#allocation8], 128  }
  0x24   :  { %827 = vsyncadd [#allocation8], 4294967168  ;;  %v44_v0 = vld [vmem:[#allocation5] sm:$0xff]  ;;  %v948_v52 = vld [vmem:[#allocation7] sm:$0xff]  ;;  %vm39_vm0 = vcmask 203776   ;;  %vm484_vm6 = vcmask 1040384  }
  0x25   :  { %v875_v1 = vmul.f32 24.0, %v44_v0  ;;  %vm834_vm8 = vmmov 0   ;;  %vm42_vm9 = vcmask 7168  }
  0x27   :  { %v88_v2 = vsub.f32 23.0, %v875_v1  ;;  %v89_v3 = vadd.f32 -21.0, %v875_v1  ;;  %v57_v4 = vadd.f32 -23.0, %v875_v1  ;;  %v104_v5 = vsub.f32 22.0, %v875_v1 }
  0x28   :  { %v105_v6 = vadd.f32 -20.0, %v875_v1  ;;  %v72_v7 = vsub.f32 24.0, %v875_v1  ;;  %v73_v8 = vadd.f32 -22.0, %v875_v1  ;;  %v136_v9 = vsub.f32 20.0, %v875_v1 }
  0x29   :  { %v885_v10 = vmin.f32 %v88_v2, %v89_v3  ;;  %v58_v11 = vmin.f32 %v57_v4, 1.0  ;;  %v137_v12 = vadd.f32 -18.0, %v875_v1  ;;  %v120_v13 = vsub.f32 21.0, %v875_v1 }
  0x2a   :  { %v889_v14 = vmin.f32 %v104_v5, %v105_v6  ;;  %v74_v15 = vmin.f32 %v72_v7, %v73_v8  ;;  %v121_v16 = vadd.f32 -19.0, %v875_v1  ;;  %v168_v21 = vsub.f32 18.0, %v875_v1 }
  0x2b   :  { %v91_v17 = vmax.f32 %v885_v10, 0.0  ;;  %v59_v18 = vmax.f32 %v58_v11, 0.0  ;;  %v894_v20 = vmin.f32 %v136_v9, %v137_v12  ;;  %v169_v22 = vadd.f32 -16.0, %v875_v1 }
  0x2c   :  { %v107_v19 = vmax.f32 %v889_v14, 0.0  ;;  %v75_v23 = vmax.f32 %v74_v15, 0.0  ;;  %v900_v24 = vmin.f32 %v120_v13, %v121_v16  ;;  %v152_v25 = vsub.f32 19.0, %v875_v1 }
  0x2d   :  { %95 = vadd.xlane.f32.xlu1 %v91_v17  ;;  %63 = vadd.xlane.f32.xlu0 %v59_v18  ;;  %v153_v26 = vadd.f32 -17.0, %v875_v1  ;;  %v139_v27 = vmax.f32 %v894_v20, 0.0  ;;  %v905_v28 = vmin.f32 %v168_v21, %v169_v22  ;;  %v200_v29 = vsub.f32 16.0, %v875_v1 }
  0x2e   :  { %v201_v30 = vadd.f32 -14.0, %v875_v1  ;;  %v123_v31 = vmax.f32 %v900_v24, 0.0  ;;  %v184_v33 = vsub.f32 17.0, %v875_v1  ;;  %v185_v34 = vadd.f32 -15.0, %v875_v1 }
  0x2f   :  { %v912_v32 = vmin.f32 %v152_v25, %v153_v26  ;;  %v171_v35 = vmax.f32 %v905_v28, 0.0  ;;  %v232_v37 = vsub.f32 14.0, %v875_v1  ;;  %v233_v38 = vadd.f32 -12.0, %v875_v1 }
  0x30   :  { %v917_v36 = vmin.f32 %v200_v29, %v201_v30  ;;  %v924_v40 = vmin.f32 %v184_v33, %v185_v34  ;;  %v216_v41 = vsub.f32 15.0, %v875_v1  ;;  %v217_v42 = vadd.f32 -13.0, %v875_v1 }
  0x31   :  { %111 = vadd.xlane.f32.xlu1 %v107_v19  ;;  %79 = vadd.xlane.f32.xlu0 %v75_v23  ;;  %v155_v39 = vmax.f32 %v912_v32, 0.0  ;;  %v928_v43 = vmin.f32 %v232_v37, %v233_v38  ;;  %v248_v44 = vsub.f32 13.0, %v875_v1  ;;  %v249_v48 = vadd.f32 -11.0, %v875_v1 }
  0x32   :  { %v203_v45 = vmax.f32 %v917_v36, 0.0  ;;  %v187_v46 = vmax.f32 %v924_v40, 0.0  ;;  %v937_v47 = vmin.f32 %v216_v41, %v217_v42  ;;  %v264_v53 = vsub.f32 12.0, %v875_v1 }
  0x33   :  { %v235_v49 = vmax.f32 %v928_v43, 0.0  ;;  %v946_v51 = vmin.f32 %v248_v44, %v249_v48  ;;  %v265_v54 = vadd.f32 -10.0, %v875_v1  ;;  %v67_v55 = vmul.f32 %v59_v18, %v948_v52 }
  0x34   :  { %v219_v50 = vmax.f32 %v937_v47, 0.0  ;;  %v280_v58 = vsub.f32 11.0, %v875_v1  ;;  %v281_v59 = vadd.f32 -9.0, %v875_v1  ;;  %v83_v60 = vmul.f32 %v75_v23, %v948_v52 }
  0x35   :  { %143 = vadd.xlane.f32.xlu1 %v139_v27  ;;  %127 = vadd.xlane.f32.xlu0 %v123_v31  ;;  %v251_v56 = vmax.f32 %v946_v51, 0.0  ;;  %v958_v57 = vmin.f32 %v264_v53, %v265_v54  ;;  %v296_v61 = vsub.f32 10.0, %v875_v1  ;;  %v297_v0 = vadd.f32 -8.0, %v875_v1 }
  0x36   :  { %v967_v63 = vmin.f32 %v280_v58, %v281_v59  ;;  %v830_v2 = vmov 0.0   ;;  %v99_v3 = vmul.f32 %v91_v17, %v948_v52  ;;  %v312_v6 = vsub.f32 9.0, %v875_v1 }
  0x37   :  { %v267_v62 = vmax.f32 %v958_v57, 0.0  ;;  %40 = vst.msk [vmem:[#allocation2] sm:$0xff] %vm39_vm0, %v830_v2  ;;  %41 = vst.msk [vmem:[#allocation3] sm:$0xff] %vm39_vm0, %v830_v2  ;;  %v980_v5 = vmin.f32 %v296_v61, %v297_v0  ;;  %v313_v7 = vadd.f32 -7.0, %v875_v1  ;;  %v115_v8 = vmul.f32 %v107_v19, %v948_v52  ;;  %732 = vmatprep.mubr.msk.f32.mxu0 %vm834_vm8, %v830_v2 }
  0x38   :  { %v283_v4 = vmax.f32 %v967_v63, 0.0  ;;  %v328_v11 = vsub.f32 8.0, %v875_v1  ;;  %v329_v12 = vadd.f32 -6.0, %v875_v1  ;;  %v131_v13 = vmul.f32 %v123_v31, %v948_v52  ;;  %743 = vmatprep.mubr.msk.f32.mxu1 %vm834_vm8, %v830_v2  ;;  %43 = vst.msk [vmem:[#allocation4] sm:$0xff] %vm42_vm9, %v830_v2 }
  0x39   :  { %175 = vadd.xlane.f32.xlu1 %v171_v35  ;;  %159 = vadd.xlane.f32.xlu0 %v155_v39  ;;  %v299_v9 = vmax.f32 %v980_v5, 0.0  ;;  %v990_v10 = vmin.f32 %v312_v6, %v313_v7  ;;  %v344_v16 = vsub.f32 7.0, %v875_v1  ;;  %v345_v17 = vadd.f32 -5.0, %v875_v1 }
  0x3a   :  { %v998_v15 = vmin.f32 %v328_v11, %v329_v12  ;;  %v147_v18 = vmul.f32 %v139_v27, %v948_v52  ;;  %v360_v22 = vsub.f32 6.0, %v875_v1  ;;  %v361_v23 = vadd.f32 -4.0, %v875_v1 }
  0x3b   :  { %v315_v14 = vmax.f32 %v990_v10, 0.0  ;;  %v346_v21 = vmin.f32 %v344_v16, %v345_v17  ;;  %v163_v24 = vmul.f32 %v155_v39, %v948_v52  ;;  %v376_v20 = vsub.f32 5.0, %v875_v1 }
  0x3c   :  { %v331_v19 = vmax.f32 %v998_v15, 0.0  ;;  %v362_v26 = vmin.f32 %v360_v22, %v361_v23  ;;  %v377_v27 = vadd.f32 -3.0, %v875_v1  ;;  %v179_v29 = vmul.f32 %v171_v35, %v948_v52 }
  0x3d   :  { %207 = vadd.xlane.f32.xlu1 %v203_v45  ;;  %191 = vadd.xlane.f32.xlu0 %v187_v46  ;;  %v347_v25 = vmax.f32 %v346_v21, 0.0  ;;  %v392_v33 = vsub.f32 4.0, %v875_v1  ;;  %v393_v32 = vadd.f32 -2.0, %v875_v1  ;;  %v195_v34 = vmul.f32 %v187_v46, %v948_v52 }
  0x3e   :  { %v363_v30 = vmax.f32 %v362_v26, 0.0  ;;  %v378_v31 = vmin.f32 %v376_v20, %v377_v27  ;;  %v408_v39 = vsub.f32 3.0, %v875_v1  ;;  %v409_v28 = vadd.f32 -1.0, %v875_v1  ;;  %v55_v16 = vld [vmem:[#allocation2] sm:$0xff] }
  0x3f   :  { %v394_v38 = vmin.f32 %v392_v33, %v393_v32  ;;  %v211_v41 = vmul.f32 %v203_v45, %v948_v52  ;;  %v424_v44 = vsub.f32 2.0, %v875_v1  ;;  %v227_v46 = vmul.f32 %v219_v50, %v948_v52 }
  0x40   :  { %v379_v37 = vmax.f32 %v378_v31, 0.0  ;;  %v410_v42 = vmin.f32 %v408_v39, %v409_v28  ;;  %v440_v53 = vsub.f32 1.0, %v875_v1  ;;  %v243_v36 = vmul.f32 %v235_v49, %v948_v52 }
  0x41   :  { %239 = vadd.xlane.f32.xlu1 %v235_v49  ;;  %223 = vadd.xlane.f32.xlu0 %v219_v50  ;;  %v395_v35 = vmax.f32 %v394_v38, 0.0  ;;  %v426_v48 = vmin.f32 %v424_v44, %v875_v1  ;;  %v259_v47 = vmul.f32 %v251_v56, %v948_v52  ;;  %v275_v1 = vmul.f32 %v267_v62, %v948_v52 }
  0x42   :  { %v411_v40 = vmax.f32 %v410_v42, 0.0  ;;  %v441_v45 = vmin.f32 %v440_v53, 1.0  ;;  %v291_v50 = vmul.f32 %v283_v4, %v948_v52  ;;  %v307_v43 = vmul.f32 %v299_v9, %v948_v52 }
  0x43   :  { %v427_v54 = vmax.f32 %v426_v48, 0.0  ;;  %v323_v49 = vmul.f32 %v315_v14, %v948_v52  ;;  %v339_v51 = vmul.f32 %v331_v19, %v948_v52  ;;  %v53_v57 = vlaneseq }
  0x44   :  { %v371_v58 = vmul.f32 %v363_v30, %v948_v52  ;;  %v387_v59 = vmul.f32 %v379_v37, %v948_v52  ;;  %v403_v63 = vmul.f32 %v395_v35, %v948_v52  ;;  %v419_v0 = vmul.f32 %v411_v40, %v948_v52 }
  0x45   :  { %255 = vadd.xlane.f32.xlu1 %v251_v56  ;;  %68 = vadd.xlane.f32.xlu0 %v67_v55  ;;  %v442_v55 = vmax.f32 %v441_v45, 0.0  ;;  %v355_v56 = vmul.f32 %v347_v25, %v948_v52  ;;  %v1052_v61 = vand.u32 127, %v53_v57  ;;  %v832_v5 = vmov 1.0|1.0  }
  0x46   :  { %v435_v7 = vmul.f32 %v427_v54, %v948_v52  ;;  %v833_v10 = vmov 1.0   ;;  %v835_v12 = vmov 0  }
  0x47   :  { %768 = vset.pattern.permute.xlu1 %v835_v12  ;;  %769 = vset.pattern.permute.xlu0 %v835_v12  ;;  %vm60_vm10 = vcmp.eq.s32.totalorder %v1052_v61, 0  ;;  %vm76_vm11 = vcmp.eq.s32.totalorder %v1052_v61, 1  ;;  %vm92_vm12 = vcmp.eq.s32.totalorder %v1052_v61, 2  ;;  %vm108_vm13 = vcmp.eq.s32.totalorder %v1052_v61, 3 }
  0x48   :  { %v1076_v17 = vsel %vm76_vm11, 1.0, %v830_v2  ;;  %v1085_v26 = vsel %vm108_vm13, 1.0, %v830_v2  ;;  %vm124_vm14 = vcmp.eq.s32.totalorder %v1052_v61, 4  ;;  %vm140_vm15 = vcmp.eq.s32.totalorder %v1052_v61, 5 }
  0x49   :  { %271 = vadd.xlane.f32.xlu1 %v267_v62  ;;  %84 = vadd.xlane.f32.xlu0 %v83_v60  ;;  %v465_v60 = vshrl.u32 %v53_v57, 7  ;;  %v1090_v31 = vsel %vm124_vm14, 1.0, %v830_v2  ;;  %v1095_v38 = vsel %vm140_vm15, 1.0, %v830_v2  ;;  %vm268_vm8 = vcmp.eq.s32.totalorder %v1052_v61, 13 }
  0x4a   :  { %vm300_vm11 = vcmp.eq.s32.totalorder %v1052_v61, 15  ;;  %vm332_vm13 = vcmp.eq.s32.totalorder %v1052_v61, 17  ;;  %vm348_vm14 = vcmp.eq.s32.totalorder %v1052_v61, 18  ;;  %vm364_vm15 = vcmp.eq.s32.totalorder %v1052_v61, 19 }
  0x4b   :  { %v466_v62 = vadd.s32 8, %v465_v60  ;;  %vm469_vm1 = vcmp.le.s32.totalorder %v465_v60, %v1052_v61  ;;  %v467_v6 = vadd.s32 16, %v465_v60 }
  0x4d   :  { %287 = vadd.xlane.f32.xlu1 %v283_v4  ;;  %100 = vadd.xlane.f32.xlu0 %v99_v3  ;;  %vm470_vm2 = vcmp.le.s32.totalorder %v466_v62, %v1052_v61  ;;  %v468_v3 = vadd.s32 24, %v465_v60  ;;  %v831_v4 = vmov 0.0|0.0   ;;  %vm471_vm5 = vcmp.le.s32.totalorder %v467_v6, %v1052_v61 }
  0x4e   :  { %746 = vmatprep.subr.bf16.mxu0 %v831_v4  ;;  %vm747_vm3 = vmpackc.low %vm470_vm2, %vm469_vm1  ;;  %753 = vmatprep.subr.bf16.mxu1 %v831_v4  ;;  %vm156_vm1 = vcmp.eq.s32.totalorder %v1052_v61, 6  ;;  %vm172_vm2 = vcmp.eq.s32.totalorder %v1052_v61, 7 }
  0x4f   :  { %748 = vmatpush3.bf16.msk.msra.mxu0 %vm747_vm3, %v832_v5  ;;  %vm472_vm4 = vcmp.le.s32.totalorder %v468_v3, %v1052_v61  ;;  %755 = vmatpush3.bf16.msk.msra.mxu1 %vm747_vm3, %v832_v5  ;;  %vm751_vm7 = vmpackc.low %vm484_vm6, %vm471_vm5  ;;  %v1100_v42 = vsel %vm156_vm1, 1.0, %v830_v2  ;;  %v1105_v53 = vsel %vm172_vm2, 1.0, %v830_v2  ;;  %vm188_vm3 = vcmp.eq.s32.totalorder %v1052_v61, 8 }
  0x50   :  { %749 = vmatprep.subr.bf16.mxu0 %v831_v4  ;;  %756 = vmatprep.subr.bf16.mxu1 %v831_v4  ;;  %vm220_vm5 = vcmp.eq.s32.totalorder %v1052_v61, 10  ;;  %vm236_vm6 = vcmp.eq.s32.totalorder %v1052_v61, 11  ;;  %vm380_vm1 = vcmp.eq.s32.totalorder %v1052_v61, 20  ;;  %vm396_vm2 = vcmp.eq.s32.totalorder %v1052_v61, 21 }
  0x51   :  { %303 = vadd.xlane.f32.xlu1 %v299_v9  ;;  %116 = vadd.xlane.f32.xlu0 %v115_v8  ;;  %v450_v8 = vmul.f32 %v442_v55, %v948_v52  ;;  %v701_v9 = vsel %vm472_vm4, 1.0, %v830_v2  ;;  %vm204_vm4 = vcmp.eq.s32.totalorder %v1052_v61, 9  ;;  %v1120_v60 = vsel %vm220_vm5, 1.0, %v830_v2 }
  0x52   :  { %v750_v11 = vpack.c.bf16 %v701_v9, %v833_v10  ;;  %v1126_v4 = vsel %vm236_vm6, 1.0, %v830_v2  ;;  %vm443_vm5 = vcmp.eq.s32.totalorder %v1052_v61, 24 }
  0x54   :  { %752 = vmatpush3.bf16.msk.msra.mxu0 %vm751_vm7, %v750_v11  ;;  %759 = vmatpush3.bf16.msk.msra.mxu1 %vm751_vm7, %v750_v11  ;;  %vm252_vm7 = vcmp.eq.s32.totalorder %v1052_v61, 12 }
  0x55   :  { %319 = vadd.xlane.f32.xlu1 %v315_v14  ;;  %132 = vadd.xlane.f32.xlu0 %v131_v13  ;;  %v1070_v13 = vsel %vm60_vm10, 1.0, %v830_v2  ;;  %vm284_vm10 = vcmp.eq.s32.totalorder %v1052_v61, 14 }
  0x59   :  { %335 = vadd.xlane.f32.xlu1 %v331_v19  ;;  %148 = vadd.xlane.f32.xlu0 %v147_v18  ;;  %v1079_v18 = vsel %vm92_vm12, 1.0, %v830_v2  ;;  %vm316_vm12 = vcmp.eq.s32.totalorder %v1052_v61, 16 }
  0x5d   :  { %351 = vadd.xlane.f32.xlu1 %v347_v25  ;;  %164 = vadd.xlane.f32.xlu0 %v163_v24 }
  0x61   :  { %367 = vadd.xlane.f32.xlu1 %v363_v30  ;;  %180 = vadd.xlane.f32.xlu0 %v179_v29 }
  0x65   :  { %383 = vadd.xlane.f32.xlu1 %v379_v37  ;;  %196 = vadd.xlane.f32.xlu0 %v195_v34 }
  0x69   :  { %399 = vadd.xlane.f32.xlu1 %v395_v35  ;;  %212 = vadd.xlane.f32.xlu0 %v211_v41 }
  0x6d   :  { %415 = vadd.xlane.f32.xlu1 %v411_v40  ;;  %228 = vadd.xlane.f32.xlu0 %v227_v46 }
  0x71   :  { %431 = vadd.xlane.f32.xlu1 %v427_v54  ;;  %244 = vadd.xlane.f32.xlu0 %v243_v36 }
  0x75   :  { %446 = vadd.xlane.f32.xlu1 %v442_v55  ;;  %260 = vadd.xlane.f32.xlu0 %v259_v47  ;;  %v1110_v47 = vsel %vm188_vm3, 1.0, %v830_v2  ;;  %vm412_vm3 = vcmp.eq.s32.totalorder %v1052_v61, 22 }
  0x79   :  { %276 = vadd.xlane.f32.xlu0 %v275_v1  ;;  %292 = vadd.xlane.f32.xlu1 %v291_v50 }
  0x7d   :  { %308 = vadd.xlane.f32.xlu0 %v307_v43  ;;  %324 = vadd.xlane.f32.xlu1 %v323_v49 }
  0x81   :  { %340 = vadd.xlane.f32.xlu0 %v339_v51  ;;  %356 = vadd.xlane.f32.xlu1 %v355_v56  ;;  %v1115_v51 = vsel %vm204_vm4, 1.0, %v830_v2  ;;  %vm428_vm4 = vcmp.eq.s32.totalorder %v1052_v61, 23 }
  0x85   :  { %372 = vadd.xlane.f32.xlu0 %v371_v58  ;;  %388 = vadd.xlane.f32.xlu1 %v387_v59 }
  0x89   :  { %404 = vadd.xlane.f32.xlu0 %v403_v63  ;;  %420 = vadd.xlane.f32.xlu1 %v419_v0 }
  0x8d   :  { %436 = vadd.xlane.f32.xlu0 %v435_v7  ;;  %451 = vadd.xlane.f32.xlu1 %v450_v8  ;;  %v1129_v8 = vsel %vm252_vm7, 1.0, %v830_v2 }
  0x91   :  { %48 = vadd.xlane.f32.xlu0 %v948_v52 }
  0xba   :  { %v96_v14 = vpop.xlane.xlu1 %95  ;;  %v64_v15 = vpop.xlane.xlu0 %63 }
  0xbb   :  { %v65_v52 = vmul.f32 %v1070_v13, %v64_v15  ;;  %v97_v24 = vmul.f32 %v1079_v18, %v96_v14  ;;  %v1136_v15 = vsel %vm268_vm8, 1.0, %v830_v2 }
  0xbd   :  { %v66_v22 = vadd.f32 %v65_v52, %v55_v16  ;;  %v1140_v52 = vsel %vm284_vm10, 1.0, %v830_v2 }
  0xbe   :  { %v112_v19 = vpop.xlane.xlu1 %111  ;;  %v80_v21 = vpop.xlane.xlu0 %79 }
  0xbf   :  { %v81_v23 = vmul.f32 %v1076_v17, %v80_v21  ;;  %v113_v30 = vmul.f32 %v1085_v26, %v112_v19 }
  0xc1   :  { %v82_v25 = vadd.f32 %v81_v23, %v66_v22 }
  0xc2   :  { %v144_v20 = vpop.xlane.xlu1 %143  ;;  %v128_v27 = vpop.xlane.xlu0 %127 }
  0xc3   :  { %v98_v29 = vadd.f32 %v97_v24, %v82_v25  ;;  %v129_v37 = vmul.f32 %v1090_v31, %v128_v27  ;;  %v145_v41 = vmul.f32 %v1095_v38, %v144_v20  ;;  %v56_v24 = vld [vmem:[#allocation3] sm:$0xff]  ;;  %v1146_v25 = vsel %vm300_vm11, 1.0, %v830_v2 }
  0xc5   :  { %v114_v34 = vadd.f32 %v113_v30, %v98_v29  ;;  %v1152_v29 = vsel %vm316_vm12, 1.0, %v830_v2 }
  0xc6   :  { %v176_v33 = vpop.xlane.xlu1 %175  ;;  %v160_v32 = vpop.xlane.xlu0 %159 }
  0xc7   :  { %v130_v35 = vadd.f32 %v129_v37, %v114_v34  ;;  %v161_v48 = vmul.f32 %v1100_v42, %v160_v32  ;;  %v177_v55 = vmul.f32 %v1105_v53, %v176_v33 }
  0xc9   :  { %v146_v46 = vadd.f32 %v145_v41, %v130_v35 }
  0xca   :  { %v208_v39 = vpop.xlane.xlu1 %207  ;;  %v192_v28 = vpop.xlane.xlu0 %191 }
  0xcb   :  { %v162_v45 = vadd.f32 %v161_v48, %v146_v46  ;;  %v193_v49 = vmul.f32 %v1110_v47, %v192_v28  ;;  %v209_v59 = vmul.f32 %v1115_v51, %v208_v39  ;;  %v1158_v39 = vsel %vm332_vm13, 1.0, %v830_v2 }
  0xcd   :  { %v178_v43 = vadd.f32 %v177_v55, %v162_v45  ;;  %v1170_v45 = vsel %vm364_vm15, 1.0, %v830_v2 }
  0xce   :  { %v240_v44 = vpop.xlane.xlu1 %239  ;;  %v224_v40 = vpop.xlane.xlu0 %223 }
  0xcf   :  { %v194_v58 = vadd.f32 %v193_v49, %v178_v43  ;;  %v225_v3 = vmul.f32 %v1120_v60, %v224_v40  ;;  %v241_v9 = vmul.f32 %v1126_v4, %v240_v44  ;;  %v1164_v44 = vsel %vm348_vm14, 1.0, %v830_v2 }
  0xd0   :  { %v1176_v43 = vsel %vm380_vm1, 1.0, %v830_v2 }
  0xd1   :  { %v210_v0 = vadd.f32 %v209_v59, %v194_v58 }
  0xd2   :  { %v256_v54 = vpop.xlane.xlu1 %255  ;;  %v69_v36 = vpop.xlane.xlu0 %68 }
  0xd3   :  { %v226_v7 = vadd.f32 %v225_v3, %v210_v0  ;;  %v257_v14 = vmul.f32 %v1129_v8, %v256_v54  ;;  %v70_v22 = vmul.f32 %v1070_v13, %v69_v36 }
  0xd5   :  { %v242_v12 = vadd.f32 %v241_v9, %v226_v7  ;;  %v71_v33 = vadd.f32 %v70_v22, %v56_v24 }
  0xd6   :  { %v272_v1 = vpop.xlane.xlu1 %271  ;;  %v85_v50 = vpop.xlane.xlu0 %84 }
  0xd7   :  { %v258_v21 = vadd.f32 %v257_v14, %v242_v12  ;;  %v273_v23 = vmul.f32 %v1136_v15, %v272_v1  ;;  %v86_v20 = vmul.f32 %v1076_v17, %v85_v50  ;;  %v696_v12 = vsel %vm428_vm4, 1.0, %v830_v2 }
  0xd9   :  { %v274_v32 = vadd.f32 %v273_v23, %v258_v21  ;;  %v87_v17 = vadd.f32 %v86_v20, %v71_v33 }
  0xda   :  { %v288_v56 = vpop.xlane.xlu1 %287  ;;  %v101_v57 = vpop.xlane.xlu0 %100 }
  0xdb   :  { %v289_v27 = vmul.f32 %v1140_v52, %v288_v56  ;;  %v102_v34 = vmul.f32 %v1079_v18, %v101_v57 }
  0xdd   :  { %v290_v28 = vadd.f32 %v289_v27, %v274_v32  ;;  %v103_v46 = vadd.f32 %v102_v34, %v87_v17 }
  0xde   :  { %v304_v62 = vpop.xlane.xlu1 %303  ;;  %v117_v63 = vpop.xlane.xlu0 %116 }
  0xdf   :  { %v305_v37 = vmul.f32 %v1146_v25, %v304_v62  ;;  %v118_v35 = vmul.f32 %v1085_v26, %v117_v63  ;;  %v1182_v62 = vsel %vm396_vm2, 1.0, %v830_v2 }
  0xe1   :  { %v306_v48 = vadd.f32 %v305_v37, %v290_v28  ;;  %v119_v26 = vadd.f32 %v118_v35, %v103_v46 }
  0xe2   :  { %v320_v5 = vpop.xlane.xlu1 %319  ;;  %v133_v6 = vpop.xlane.xlu0 %132 }
  0xe3   :  { %v321_v41 = vmul.f32 %v1152_v29, %v320_v5  ;;  %v134_v54 = vmul.f32 %v1090_v31, %v133_v6  ;;  %v695_v5 = vsel %vm412_vm3, 1.0, %v830_v2 }
  0xe5   :  { %v322_v55 = vadd.f32 %v321_v41, %v306_v48  ;;  %v135_v31 = vadd.f32 %v134_v54, %v119_v26 }
  0xe6   :  { %v336_v10 = vpop.xlane.xlu1 %335  ;;  %v149_v11 = vpop.xlane.xlu0 %148 }
  0xe7   :  { %v337_v36 = vmul.f32 %v1158_v39, %v336_v10  ;;  %v150_v1 = vmul.f32 %v1095_v38, %v149_v11 }
  0xe9   :  { %v338_v57 = vadd.f32 %v337_v36, %v322_v55  ;;  %v151_v38 = vadd.f32 %v150_v1, %v135_v31 }
  0xea   :  { %v352_v16 = vpop.xlane.xlu1 %351  ;;  %v165_v19 = vpop.xlane.xlu0 %164 }
  0xeb   :  { %v353_v50 = vmul.f32 %v1164_v44, %v352_v16  ;;  %v166_v58 = vmul.f32 %v1100_v42, %v165_v19 }
  0xed   :  { %v354_v63 = vadd.f32 %v353_v50, %v338_v57  ;;  %v167_v9 = vadd.f32 %v166_v58, %v151_v38 }
  0xee   :  { %v368_v13 = vpop.xlane.xlu1 %367  ;;  %v181_v30 = vpop.xlane.xlu0 %180 }
  0xef   :  { %v369_v59 = vmul.f32 %v1170_v45, %v368_v13  ;;  %v182_v0 = vmul.f32 %v1105_v53, %v181_v30 }
  0xf1   :  { %v370_v10 = vadd.f32 %v369_v59, %v354_v63  ;;  %v183_v14 = vadd.f32 %v182_v0, %v167_v9 }
  0xf2   :  { %v384_v40 = vpop.xlane.xlu1 %383  ;;  %v197_v18 = vpop.xlane.xlu0 %196 }
  0xf3   :  { %v385_v3 = vmul.f32 %v1176_v43, %v384_v40  ;;  %v198_v42 = vmul.f32 %v1110_v47, %v197_v18  ;;  %v697_v47 = vsel %vm443_vm5, 1.0, %v830_v2 }
  0xf5   :  { %v386_v16 = vadd.f32 %v385_v3, %v370_v10  ;;  %v199_v23 = vadd.f32 %v198_v42, %v183_v14 }
  0xf6   :  { %v400_v49 = vpop.xlane.xlu1 %399  ;;  %v213_v56 = vpop.xlane.xlu0 %212 }
  0xf7   :  { %v401_v11 = vmul.f32 %v1182_v62, %v400_v49  ;;  %v214_v53 = vmul.f32 %v1115_v51, %v213_v56 }
  0xf9   :  { %v402_v24 = vadd.f32 %v401_v11, %v386_v16  ;;  %v215_v13 = vadd.f32 %v214_v53, %v199_v23  ;;  %v47_v11 = vld [vmem:[#allocation4] sm:$0xff] }
  0xfa   :  { %v416_v6 = vpop.xlane.xlu1 %415  ;;  %v229_v7 = vpop.xlane.xlu0 %228 }
  0xfb   :  { %v417_v19 = vmul.f32 %v695_v5, %v416_v6  ;;  %v230_v20 = vmul.f32 %v1120_v60, %v229_v7 }
  0xfd   :  { %v418_v30 = vadd.f32 %v417_v19, %v402_v24  ;;  %v231_v34 = vadd.f32 %v230_v20, %v215_v13 }
  0xfe   :  { %v432_v21 = vpop.xlane.xlu1 %431  ;;  %v245_v22 = vpop.xlane.xlu0 %244 }
  0xff   :  { %v433_v27 = vmul.f32 %v696_v12, %v432_v21  ;;  %v246_v33 = vmul.f32 %v1126_v4, %v245_v22 }
 0x101   :  { %v434_v37 = vadd.f32 %v433_v27, %v418_v30  ;;  %v247_v28 = vadd.f32 %v246_v33, %v231_v34 }
 0x102   :  { %v447_v32 = vpop.xlane.xlu1 %446  ;;  %v261_v61 = vpop.xlane.xlu0 %260 }
 0x103   :  { %v448_v17 = vmul.f32 %v697_v47, %v447_v32  ;;  %v262_v51 = vmul.f32 %v1129_v8, %v261_v61 }
 0x105   :  { %v449_v35 = vadd.f32 %v448_v17, %v434_v37  ;;  %v263_v60 = vadd.f32 %v262_v51, %v247_v28 }
 0x106   :  { %v277_v41 = vpop.xlane.xlu0 %276  ;;  %v293_v40 = vpop.xlane.xlu1 %292 }
 0x107   :  { %456 = vst.msk [vmem:[#allocation2] sm:$0xff] %vm39_vm0, %v449_v35  ;;  %v278_v2 = vmul.f32 %v1136_v15, %v277_v41  ;;  %v294_v18 = vmul.f32 %v1140_v52, %v293_v40 }
 0x109   :  { %v279_v46 = vadd.f32 %v278_v2, %v263_v60 }
 0x10a   :  { %v309_v4 = vpop.xlane.xlu0 %308  ;;  %v325_v48 = vpop.xlane.xlu1 %324 }
 0x10b   :  { %v295_v54 = vadd.f32 %v294_v18, %v279_v46  ;;  %v310_v36 = vmul.f32 %v1146_v25, %v309_v4  ;;  %v326_v26 = vmul.f32 %v1152_v29, %v325_v48 }
 0x10d   :  { %v311_v8 = vadd.f32 %v310_v36, %v295_v54 }
 0x10e   :  { %v341_v55 = vpop.xlane.xlu0 %340  ;;  %v1202_v1 = vld [vmem:[#allocation2] sm:$0xff]  ;;  %v357_v50 = vpop.xlane.xlu1 %356 }
 0x10f   :  { %v327_v49 = vadd.f32 %v326_v26, %v311_v8  ;;  %v342_v56 = vmul.f32 %v1158_v39, %v341_v55  ;;  %733 = vmatmul.mubr.msk.f32.vlgmr.msra.gmra.mrb[0].mxu0 %vm39_vm0, %v1202_v1  ;;  %v358_v15 = vmul.f32 %v1164_v44, %v357_v50  ;;  %v713_v23 = vadd.f32 -1.0, %v1202_v1 }
 0x110   :  { %v653_v32 = vadd.f32 1e-08, %v1202_v1 }
 0x111   :  { %v343_v52 = vadd.f32 %v342_v56, %v327_v49  ;;  %v636_v24 = vmax.f32 %v713_v23, 0.0 }
 0x112   :  { %v373_v31 = vpop.xlane.xlu0 %372  ;;  %v389_v57 = vpop.xlane.xlu1 %388 }
 0x113   :  { %v359_v58 = vadd.f32 %v358_v15, %v343_v52  ;;  %v374_v25 = vmul.f32 %v1170_v45, %v373_v31  ;;  %v390_v29 = vmul.f32 %v1176_v43, %v389_v57  ;;  %v637_v20 = vadd.f32 1e-08, %v636_v24 }
 0x115   :  { %v375_v59 = vadd.f32 %v374_v25, %v359_v58 }
 0x116   :  { %v405_v38 = vpop.xlane.xlu0 %404  ;;  %v421_v63 = vpop.xlane.xlu1 %420 }
 0x117   :  { %v391_v0 = vadd.f32 %v390_v29, %v375_v59  ;;  %v406_v3 = vmul.f32 %v1182_v62, %v405_v38  ;;  %v422_v39 = vmul.f32 %v695_v5, %v421_v63 }
 0x119   :  { %v407_v6 = vadd.f32 %v406_v3, %v391_v0 }
 0x11a   :  { %v437_v7 = vpop.xlane.xlu0 %436  ;;  %v452_v9 = vpop.xlane.xlu1 %451 }
 0x11b   :  { %v423_v10 = vadd.f32 %v422_v39, %v407_v6  ;;  %v438_v44 = vmul.f32 %v696_v12, %v437_v7  ;;  %v453_v42 = vmul.f32 %v697_v47, %v452_v9 }
 0x11d   :  { %v439_v14 = vadd.f32 %v438_v44, %v423_v10 }
 0x11e   :  { %v49_v16 = vpop.xlane.xlu0 %48 }
 0x11f   :  { %v454_v53 = vadd.f32 %v453_v42, %v439_v14  ;;  %v50_v45 = vadd.f32 %v49_v16, %v47_v11 }
 0x121   :  { %457 = vst.msk [vmem:[#allocation3] sm:$0xff] %vm39_vm0, %v454_v53 }
 0x122   :  { %52 = vst.msk [vmem:[#allocation4] sm:$0xff] %vm42_vm9, %v50_v45 }
 0x128   :  { %v462_v43 = vld [vmem:[#allocation3] sm:$0xff] }
 0x129   :  { %v463_v19 = vld [vmem:[#allocation4] sm:$0xff]  ;;  %744 = vmatmul.mubr.msk.f32.vlgmr.msra.gmra.mrb[0].mxu1 %vm39_vm0, %v462_v43  ;;  %v712_v30 = vadd.f32 -1.0, %v462_v43 }
 0x12a   :  { %770 = vrcp.f32 %v463_v19 }
 0x12b   :  { %v634_v33 = vmax.f32 %v712_v30, 0.0 }
 0x134   :  { %v771_v62 = vpop.eup %770 }
 0x135   :  { %659 = vperm.xlu1 %768, %v771_v62  }
 0x1b4   :  { %v660_v54 = vpop.permute.xlu1 %659 }
 0x1e2   :  { %v554_v5 = vpop.f32.mrb[0].mxu0 }
 0x1e3   :  { %v631_v12 = vsub.f32 %v554_v5, %v1202_v1  ;;  %v734_v21 = vpop.f32.mrb[1].mxu0  ;;  %v645_v27 = vadd.f32 1.0, %v554_v5 }
 0x1e5   :  { %v642_v22 = vadd.f32 1.0, %v631_v12 }
 0x1e7   :  { %772 = vrcp.f32 %v642_v22 }
 0x1e8   :  { %774 = vrcp.f32 %v637_v20 }
 0x1f1   :  { %v773_v47 = vpop.eup %772 }
 0x1f2   :  { %v647_v13 = vmul.f32 %v773_v47, %v645_v27  ;;  %v775_v61 = vpop.eup %774 }
 0x1f3   :  { %v639_v37 = vmul.f32 %v775_v61, %v634_v33 }
 0x1f4   :  { %776 = vlog2.f32 %v647_v13 }
 0x1f5   :  { %778 = vrcp.f32 %v653_v32  ;;  %v643_v35 = vmul.f32 %v642_v22, %v639_v37  ;;  %v640_v2 = vmul.f32 %v639_v37, %v1202_v1 }
 0x1fc   :  { %v627_v34 = vpop.f32.mrb[0].mxu1 }
 0x1fd   :  { %v632_v17 = vsub.f32 %v627_v34, %v462_v43  ;;  %v745_v51 = vpop.f32.mrb[1].mxu1 }
 0x1fe   :  { %v777_v28 = vpop.eup %776 }
 0x1ff   :  { %v641_v41 = vadd.f32 1.0, %v632_v17  ;;  %v649_v60 = vmul.f32 0.6931472, %v777_v28  ;;  %v779_v48 = vpop.eup %778 }
 0x201   :  { %v644_v40 = vsub.f32 %v641_v41, %v643_v35 }
 0x203   :  { %v650_v18 = vmul.f32 %v649_v60, %v644_v40 }
 0x205   :  { %v651_v46 = vadd.f32 %v650_v18, %v640_v2 }
 0x207   :  { %v652_v4 = vmul.f32 %v651_v46, %v462_v43 }
 0x209   :  { %v655_v36 = vmul.f32 %v779_v48, %v652_v4 }
 0x20b   :  { %v662_v26 = vmul.f32 %v660_v54, %v655_v36 }
 0x20d   :  { %v663_v8 = vsel %vm39_vm0, %v662_v26, 0.0 }
 0x20e   :  { %664 = vadd.xlane.f32.xlu0 %v663_v8 }
 0x29b   :  { %v665_v55 = vpop.xlane.xlu0 %664 }
 0x29c   :  { %666 = vst.msk [vmem:[%s1225_s2] sm:$0xff] %vm42_vm9, %v665_v55 }
 0x29d   :  { %671 = vsyncpa [#allocation6], 1 }
 0x29e   :  { %672 = vsyncpa [#allocation8], 1 }

</bundles_post_ra>
